<compile_context>
chip_gen: v5e
topology: v5e:2x2
jax: 0.10.0
libtpu: 0.0.40
codegen_flags: <defaults>
</compile_context>

<pallas_src>
import jax
import jax.numpy as jnp
from jax.experimental import pallas as pl
from jax.experimental.pallas import tpu as pltpu

EPS = 1e-5   # torch.nn.LayerNorm default
PAD = 128    # lane-dense output width


def _ln(x, gamma, beta):
    mu = jnp.mean(x, axis=-1, keepdims=True)
    var = jnp.mean((x - mu) ** 2, axis=-1, keepdims=True)
    return (x - mu) * jax.lax.rsqrt(var + EPS) * gamma + beta


def _relu(x):
    return jnp.maximum(x, 0.0)


def _pad_lanes(x, width):
    rows, d = x.shape
    return jnp.concatenate([x, jnp.zeros((rows, width - d), x.dtype)], axis=1)


# ------------------------------ fused kernel -------------------------------

def mpnn_kernel(node_in, edge_in, graph_in,
                gr, gc, gg, sr, sg,
                e_g_nr, e_b_nr, e_g_nc, e_b_nc, e_g_e, e_b_e, e_g_g, e_b_g,
                e_Wf, e_bf, e_g_h, e_b_h, e_W1, e_b1,
                n_g_n, n_b_n, n_g_e, n_b_e,
                n_Wf, n_bf, n_g_h, n_b_h, n_W1, n_b1,
                node_out, edge_out, graph_out,
                node_acc, edge_acc, graph_acc):
    layer = pl.program_id(0)
    nd = node_acc.shape[1]

    # Load the carried activations into VMEM scratch on the first layer only.
    @pl.when(layer == 0)
    def _init():
        node_acc[...] = node_in[...]
        edge_acc[...] = edge_in[...]
        graph_acc[...] = graph_in[...]

    nfe = node_acc[...]
    efe = edge_acc[...]
    gfe = graph_acc[...]

    # ------------------------------ edge model ------------------------------
    nr = _relu(_ln(nfe, e_g_nr[...], e_b_nr[...]))
    nc = _relu(_ln(nfe, e_g_nc[...], e_b_nc[...]))
    el = _relu(_ln(efe, e_g_e[...], e_b_e[...]))
    gl = _relu(_ln(gfe, e_g_g[...], e_b_g[...]))

    # One-hot gathers to edge rows on the MXU.
    nr_e = jnp.dot(gr[...], nr, preferred_element_type=jnp.float32)   # [E, nd]
    nc_e = jnp.dot(gc[...], nc, preferred_element_type=jnp.float32)   # [E, nd]
    gl_e = jnp.dot(gg[...], gl, preferred_element_type=jnp.float32)   # [E, gd]

    # Fused fc0: one wide matmul instead of four tiny ones.
    fused = jnp.concatenate([nr_e, nc_e, el, gl_e], axis=1)            # [E, 2nd+ed+gd]
    h = jnp.dot(fused, e_Wf[...], preferred_element_type=jnp.float32) + e_bf[...]
    h = _relu(_ln(h, e_g_h[...], e_b_h[...]))
    edge_new = efe + jnp.dot(h, e_W1[...], preferred_element_type=jnp.float32) + e_b1[...]

    # ------------------------------ node model ------------------------------
    # scatter_sum(edge_feats, row) as one-hot matmul.
    msgs = jnp.dot(sr[...], edge_new, preferred_element_type=jnp.float32)  # [N, ed]
    nl = _relu(_ln(nfe, n_g_n[...], n_b_n[...]))
    ml = _relu(_ln(msgs, n_g_e[...], n_b_e[...]))
    h2 = jnp.dot(jnp.concatenate([nl, ml], axis=1), n_Wf[...],
                 preferred_element_type=jnp.float32) + n_bf[...]
    h2 = _relu(_ln(h2, n_g_h[...], n_b_h[...]))
    out = jnp.dot(h2, n_W1[...], preferred_element_type=jnp.float32) + n_b1[...]  # [N, nd+gd]
    node_part = out[:, :nd]
    graph_part = out[:, nd:]

    node_new = nfe + node_part
    graph_new = gfe + jnp.dot(sg[...], graph_part, preferred_element_type=jnp.float32)

    # Carry for the next layer.
    node_acc[...] = node_new
    edge_acc[...] = edge_new
    graph_acc[...] = graph_new

    # Lane-dense (128-wide) output slabs; flushed to HBM once at grid end.
    node_out[...] = _pad_lanes(node_new, PAD)
    edge_out[...] = _pad_lanes(edge_new, PAD)
    graph_out[...] = _pad_lanes(graph_new, PAD)


# ------------------------------ Python wrapper ------------------------------

def mpnn_forward(node_feats, edge_feats, edge_index, graph_feats, graph_index, params_list):
    N, nd = node_feats.shape
    E, ed = edge_feats.shape
    G, gd = graph_feats.shape
    hd = params_list[0]["e_W1"].shape[0]
    L = len(params_list)
    f32 = jnp.float32

    row, col = edge_index[0], edge_index[1]
    gi_row = graph_index[row]

    # Graph-structure one-hot matrices (built once; fixed across layers).
    gather_row = (row[:, None] == jnp.arange(N)[None, :]).astype(f32)            # [E, N]
    gather_col = (col[:, None] == jnp.arange(N)[None, :]).astype(f32)            # [E, N]
    gather_graph = (gi_row[:, None] == jnp.arange(G)[None, :]).astype(f32)       # [E, G]
    scatter_row = (row[None, :] == jnp.arange(N)[:, None]).astype(f32)           # [N, E]
    scatter_graph = (graph_index[None, :] == jnp.arange(G)[:, None]).astype(f32) # [G, N]

    def stk(key):
        return jnp.stack([p[key] for p in params_list], axis=0)

    # Fused / stacked per-layer weights.
    e_Wf = jnp.stack([jnp.concatenate([p["e_Wnr"], p["e_Wnc"], p["e_We"], p["e_Wg"]], axis=0)
                      for p in params_list], axis=0)                              # [L, 2nd+ed+gd, hd]
    n_Wf = jnp.stack([jnp.concatenate([p["n_Wn"], p["n_We"]], axis=0)
                      for p in params_list], axis=0)                              # [L, nd+ed, hd]
    n_W1 = jnp.stack([jnp.concatenate([p["n_W1n"], p["n_W1g"]], axis=1)
                      for p in params_list], axis=0)                              # [L, hd, nd+gd]
    n_b1 = jnp.stack([jnp.concatenate([p["n_b1n"], p["n_b1g"]], axis=1)
                      for p in params_list], axis=0)                              # [L, 1, nd+gd]

    layer_params = [
        stk("e_ln_nr_g"), stk("e_ln_nr_b"), stk("e_ln_nc_g"), stk("e_ln_nc_b"),
        stk("e_ln_e_g"), stk("e_ln_e_b"), stk("e_ln_g_g"), stk("e_ln_g_b"),
        e_Wf, stk("e_bnr"),
        stk("e_ln_h_g"), stk("e_ln_h_b"),
        stk("e_W1"), stk("e_b1"),
        stk("n_ln_n_g"), stk("n_ln_n_b"), stk("n_ln_e_g"), stk("n_ln_e_b"),
        n_Wf, stk("n_bn"),
        stk("n_ln_h_g"), stk("n_ln_h_b"),
        n_W1, n_b1,
    ]

    static_inputs = [node_feats, edge_feats, graph_feats,
                     gather_row, gather_col, gather_graph, scatter_row, scatter_graph]

    const2 = lambda l: (0, 0)
    layer3 = lambda l: (l, 0, 0)
    static_specs = [pl.BlockSpec(a.shape, const2) for a in static_inputs]
    layer_specs = [pl.BlockSpec((None,) + a.shape[1:], layer3) for a in layer_params]

    out_shapes = (jax.ShapeDtypeStruct((N, PAD), f32),
                  jax.ShapeDtypeStruct((E, PAD), f32),
                  jax.ShapeDtypeStruct((G, PAD), f32))
    out_specs = (pl.BlockSpec((N, PAD), const2),
                 pl.BlockSpec((E, PAD), const2),
                 pl.BlockSpec((G, PAD), const2))

    flops_per_layer = 2 * (2 * E * N * nd + E * G * gd + E * (2 * nd + ed + gd) * hd
                           + E * hd * ed + N * E * ed + N * (nd + ed) * hd
                           + N * hd * (nd + gd) + G * N * gd)
    bytes_accessed = 4 * (sum(int(a.size) for a in static_inputs)
                          + sum(int(a.size) for a in layer_params)
                          + (N + E + G) * PAD)
    cost = pl.CostEstimate(flops=L * flops_per_layer,
                           transcendentals=L * (4 * N + 3 * E + 2 * G),
                           bytes_accessed=bytes_accessed)

    node_o, edge_o, graph_o = pl.pallas_call(
        mpnn_kernel,
        out_shape=out_shapes,
        grid=(L,),
        in_specs=static_specs + layer_specs,
        out_specs=out_specs,
        scratch_shapes=[pltpu.VMEM((N, nd), f32),
                        pltpu.VMEM((E, ed), f32),
                        pltpu.VMEM((G, gd), f32)],
        compiler_params=pltpu.CompilerParams(
            dimension_semantics=("arbitrary",),
            vmem_limit_bytes=64 * 1024 * 1024),
        cost_estimate=cost,
    )(*static_inputs, *layer_params)

    return node_o[:, :nd], edge_o[:, :ed], graph_o[:, :gd]


# ------------------------------ parameter init ------------------------------

def init_layer_params(key, nd, ed, gd, hd):
    ks = jax.random.split(key, 14)
    def w(k, shape):
        return (0.1 * jax.random.normal(k, shape)).astype(jnp.float32)
    ones = lambda d: jnp.ones((1, d), jnp.float32)
    zeros = lambda d: jnp.zeros((1, d), jnp.float32)
    p = {}
    # edge_net
    p["e_Wnr"] = w(ks[0], (nd, hd)); p["e_bnr"] = w(ks[1], (1, hd))
    p["e_Wnc"] = w(ks[2], (nd, hd))
    p["e_We"] = w(ks[3], (ed, hd))
    p["e_Wg"] = w(ks[4], (gd, hd))
    p["e_W1"] = w(ks[5], (hd, ed)); p["e_b1"] = w(ks[6], (1, ed))
    p["e_ln_nr_g"], p["e_ln_nr_b"] = ones(nd), zeros(nd)
    p["e_ln_nc_g"], p["e_ln_nc_b"] = ones(nd), zeros(nd)
    p["e_ln_e_g"], p["e_ln_e_b"] = ones(ed), zeros(ed)
    p["e_ln_g_g"], p["e_ln_g_b"] = ones(gd), zeros(gd)
    p["e_ln_h_g"], p["e_ln_h_b"] = ones(hd), zeros(hd)
    # node_net (fc1 weight/bias split into node / graph output columns)
    p["n_Wn"] = w(ks[7], (nd, hd)); p["n_bn"] = w(ks[8], (1, hd))
    p["n_We"] = w(ks[9], (ed, hd))
    p["n_W1n"] = w(ks[10], (hd, nd)); p["n_b1n"] = w(ks[11], (1, nd))
    p["n_W1g"] = w(ks[12], (hd, gd)); p["n_b1g"] = w(ks[13], (1, gd))
    p["n_ln_n_g"], p["n_ln_n_b"] = ones(nd), zeros(nd)
    p["n_ln_e_g"], p["n_ln_e_b"] = ones(ed), zeros(ed)
    p["n_ln_h_g"], p["n_ln_h_b"] = ones(hd), zeros(hd)
    return p


# ---------------------------- pure-JAX reference ----------------------------

def mpnn_reference(node_feats, edge_feats, edge_index, graph_feats, graph_index, params_list):
    row, col = edge_index[0], edge_index[1]
    N = node_feats.shape[0]
    G = graph_feats.shape[0]
    for p in params_list:
        nr = _relu(_ln(node_feats, p["e_ln_nr_g"], p["e_ln_nr_b"])) @ p["e_Wnr"] + p["e_bnr"]
        nc = _relu(_ln(node_feats, p["e_ln_nc_g"], p["e_ln_nc_b"])) @ p["e_Wnc"]
        ef = _relu(_ln(edge_feats, p["e_ln_e_g"], p["e_ln_e_b"])) @ p["e_We"]
        gf = _relu(_ln(graph_feats, p["e_ln_g_g"], p["e_ln_g_b"])) @ p["e_Wg"]
        carry = nr[row] + nc[col] + ef + gf[graph_index[row]]
        carry = _relu(_ln(carry, p["e_ln_h_g"], p["e_ln_h_b"]))
        edge_feats = edge_feats + carry @ p["e_W1"] + p["e_b1"]

        msgs = jax.ops.segment_sum(edge_feats, row, num_segments=N)
        n_ = _relu(_ln(node_feats, p["n_ln_n_g"], p["n_ln_n_b"])) @ p["n_Wn"] + p["n_bn"]
        m_ = _relu(_ln(msgs, p["n_ln_e_g"], p["n_ln_e_b"])) @ p["n_We"]
        h = _relu(_ln(n_ + m_, p["n_ln_h_g"], p["n_ln_h_b"]))
        node_part = h @ p["n_W1n"] + p["n_b1n"]
        graph_part = h @ p["n_W1g"] + p["n_b1g"]
        node_feats = node_feats + node_part
        graph_feats = graph_feats + jax.ops.segment_sum(graph_part, graph_index, num_segments=G)
    return node_feats, edge_feats, graph_feats


# ----------------------------------- main -----------------------------------

if __name__ == "__main__":
    NODE_DIM, EDGE_DIM, GRAPH_DIM, HIDDEN_DIM = 16, 8, 12, 32
    NUM_LAYERS = 2

    key = jax.random.PRNGKey(0)
    kn, ke, kg, kp = jax.random.split(key, 4)

    # 2 graphs of 5 nodes each; bidirectional ring edges so every node is a 'row'.
    N, G = 10, 2
    graph_index = jnp.array([0] * 5 + [1] * 5, dtype=jnp.int32)
    edges = []
    for base in (0, 5):
        for i in range(5):
            a, b = base + i, base + (i + 1) % 5
            edges.append((a, b))
            edges.append((b, a))
    edge_index = jnp.array(edges, dtype=jnp.int32).T  # [2, E]
    E = edge_index.shape[1]

    node_feats = jax.random.normal(kn, (N, NODE_DIM), jnp.float32)
    edge_feats = jax.random.normal(ke, (E, EDGE_DIM), jnp.float32)
    graph_feats = jax.random.normal(kg, (G, GRAPH_DIM), jnp.float32)

    params_list = [init_layer_params(k, NODE_DIM, EDGE_DIM, GRAPH_DIM, HIDDEN_DIM)
                   for k in jax.random.split(kp, NUM_LAYERS)]

    nf, ef, gf = mpnn_forward(node_feats, edge_feats, edge_index,
                              graph_feats, graph_index, params_list)
    jax.block_until_ready(nf)
    jax.block_until_ready(ef)
    jax.block_until_ready(gf)

    rnf, ref_e, rgf = mpnn_reference(node_feats, edge_feats, edge_index,
                                     graph_feats, graph_index, params_list)
    assert jnp.allclose(nf, rnf, atol=2e-3, rtol=2e-3)
    assert jnp.allclose(ef, ref_e, atol=2e-3, rtol=2e-3)
    assert jnp.allclose(gf, rgf, atol=2e-3, rtol=2e-3)

    print("KERNEL_OK")
</pallas_src>

<mosaic_0001>
module attributes {stable_mosaic.version = 11 : i64} {
  func.func @mpnn_kernel(%arg0: i32, %arg1: memref<10x16xf32, #tpu.memory_space<vmem>>, %arg2: memref<20x8xf32, #tpu.memory_space<vmem>>, %arg3: memref<2x12xf32, #tpu.memory_space<vmem>>, %arg4: memref<20x10xf32, #tpu.memory_space<vmem>>, %arg5: memref<20x10xf32, #tpu.memory_space<vmem>>, %arg6: memref<20x2xf32, #tpu.memory_space<vmem>>, %arg7: memref<10x20xf32, #tpu.memory_space<vmem>>, %arg8: memref<2x10xf32, #tpu.memory_space<vmem>>, %arg9: memref<1x1x16xf32, #tpu.memory_space<vmem>>, %arg10: memref<1x1x16xf32, #tpu.memory_space<vmem>>, %arg11: memref<1x1x16xf32, #tpu.memory_space<vmem>>, %arg12: memref<1x1x16xf32, #tpu.memory_space<vmem>>, %arg13: memref<1x1x8xf32, #tpu.memory_space<vmem>>, %arg14: memref<1x1x8xf32, #tpu.memory_space<vmem>>, %arg15: memref<1x1x12xf32, #tpu.memory_space<vmem>>, %arg16: memref<1x1x12xf32, #tpu.memory_space<vmem>>, %arg17: memref<1x52x32xf32, #tpu.memory_space<vmem>>, %arg18: memref<1x1x32xf32, #tpu.memory_space<vmem>>, %arg19: memref<1x1x32xf32, #tpu.memory_space<vmem>>, %arg20: memref<1x1x32xf32, #tpu.memory_space<vmem>>, %arg21: memref<1x32x8xf32, #tpu.memory_space<vmem>>, %arg22: memref<1x1x8xf32, #tpu.memory_space<vmem>>, %arg23: memref<1x1x16xf32, #tpu.memory_space<vmem>>, %arg24: memref<1x1x16xf32, #tpu.memory_space<vmem>>, %arg25: memref<1x1x8xf32, #tpu.memory_space<vmem>>, %arg26: memref<1x1x8xf32, #tpu.memory_space<vmem>>, %arg27: memref<1x24x32xf32, #tpu.memory_space<vmem>>, %arg28: memref<1x1x32xf32, #tpu.memory_space<vmem>>, %arg29: memref<1x1x32xf32, #tpu.memory_space<vmem>>, %arg30: memref<1x1x32xf32, #tpu.memory_space<vmem>>, %arg31: memref<1x32x28xf32, #tpu.memory_space<vmem>>, %arg32: memref<1x1x28xf32, #tpu.memory_space<vmem>>, %arg33: memref<10x128xf32, #tpu.memory_space<vmem>>, %arg34: memref<20x128xf32, #tpu.memory_space<vmem>>, %arg35: memref<2x128xf32, #tpu.memory_space<vmem>>, %arg36: memref<10x16xf32, #tpu.memory_space<vmem>>, %arg37: memref<20x8xf32, #tpu.memory_space<vmem>>, %arg38: memref<2x12xf32, #tpu.memory_space<vmem>>) attributes {dimension_semantics = [#tpu.dimension_semantics<arbitrary>], iteration_bounds = array<i64: 2>, scalar_prefetch = 0 : i64, scratch_operands = 3 : i64, tpu.core_type = #tpu.core_type<tc>, window_params = [{pipeline_mode = #tpu.pipeline_mode<synchronous>, transform_indices = @transform_0, window_bounds = array<i64: 10, 16>}, {pipeline_mode = #tpu.pipeline_mode<synchronous>, transform_indices = @transform_1, window_bounds = array<i64: 20, 8>}, {pipeline_mode = #tpu.pipeline_mode<synchronous>, transform_indices = @transform_2, window_bounds = array<i64: 2, 12>}, {pipeline_mode = #tpu.pipeline_mode<synchronous>, transform_indices = @transform_3, window_bounds = array<i64: 20, 10>}, {pipeline_mode = #tpu.pipeline_mode<synchronous>, transform_indices = @transform_4, window_bounds = array<i64: 20, 10>}, {pipeline_mode = #tpu.pipeline_mode<synchronous>, transform_indices = @transform_5, window_bounds = array<i64: 20, 2>}, {pipeline_mode = #tpu.pipeline_mode<synchronous>, transform_indices = @transform_6, window_bounds = array<i64: 10, 20>}, {pipeline_mode = #tpu.pipeline_mode<synchronous>, transform_indices = @transform_7, window_bounds = array<i64: 2, 10>}, {transform_indices = @transform_8, window_bounds = array<i64: 1, 1, 16>}, {transform_indices = @transform_9, window_bounds = array<i64: 1, 1, 16>}, {transform_indices = @transform_10, window_bounds = array<i64: 1, 1, 16>}, {transform_indices = @transform_11, window_bounds = array<i64: 1, 1, 16>}, {transform_indices = @transform_12, window_bounds = array<i64: 1, 1, 8>}, {transform_indices = @transform_13, window_bounds = array<i64: 1, 1, 8>}, {transform_indices = @transform_14, window_bounds = array<i64: 1, 1, 12>}, {transform_indices = @transform_15, window_bounds = array<i64: 1, 1, 12>}, {transform_indices = @transform_16, window_bounds = array<i64: 1, 52, 32>}, {transform_indices = @transform_17, window_bounds = array<i64: 1, 1, 32>}, {transform_indices = @transform_18, window_bounds = array<i64: 1, 1, 32>}, {transform_indices = @transform_19, window_bounds = array<i64: 1, 1, 32>}, {transform_indices = @transform_20, window_bounds = array<i64: 1, 32, 8>}, {transform_indices = @transform_21, window_bounds = array<i64: 1, 1, 8>}, {transform_indices = @transform_22, window_bounds = array<i64: 1, 1, 16>}, {transform_indices = @transform_23, window_bounds = array<i64: 1, 1, 16>}, {transform_indices = @transform_24, window_bounds = array<i64: 1, 1, 8>}, {transform_indices = @transform_25, window_bounds = array<i64: 1, 1, 8>}, {transform_indices = @transform_26, window_bounds = array<i64: 1, 24, 32>}, {transform_indices = @transform_27, window_bounds = array<i64: 1, 1, 32>}, {transform_indices = @transform_28, window_bounds = array<i64: 1, 1, 32>}, {transform_indices = @transform_29, window_bounds = array<i64: 1, 1, 32>}, {transform_indices = @transform_30, window_bounds = array<i64: 1, 32, 28>}, {transform_indices = @transform_31, window_bounds = array<i64: 1, 1, 28>}, {pipeline_mode = #tpu.pipeline_mode<synchronous>, transform_indices = @transform_32, window_bounds = array<i64: 10, 128>}, {pipeline_mode = #tpu.pipeline_mode<synchronous>, transform_indices = @transform_33, window_bounds = array<i64: 20, 128>}, {pipeline_mode = #tpu.pipeline_mode<synchronous>, transform_indices = @transform_34, window_bounds = array<i64: 2, 128>}]} {
    %c0_i32 = arith.constant 0 : i32
    %0 = arith.cmpi eq, %arg0, %c0_i32 : i32
    %1 = arith.extui %0 : i1 to i32
    %c0_i32_0 = arith.constant 0 : i32
    %2 = arith.cmpi ne, %1, %c0_i32_0 : i32
    scf.if %2 {
      %c0_159 = arith.constant 0 : index
      %c0_160 = arith.constant 0 : index
      %287 = vector.load %arg1[%c0_159, %c0_160] : memref<10x16xf32, #tpu.memory_space<vmem>>, vector<10x16xf32>
      %c0_161 = arith.constant 0 : index
      %c0_162 = arith.constant 0 : index
      %288 = vector.load %arg36[%c0_161, %c0_162] : memref<10x16xf32, #tpu.memory_space<vmem>>, vector<10x16xf32>
      tpu.vector_store %arg36[%c0_161, %c0_162], %287 {strides = array<i32>} : memref<10x16xf32, #tpu.memory_space<vmem>>, vector<10x16xf32>,
      %c0_163 = arith.constant 0 : index
      %c0_164 = arith.constant 0 : index
      %289 = vector.load %arg2[%c0_163, %c0_164] : memref<20x8xf32, #tpu.memory_space<vmem>>, vector<20x8xf32>
      %c0_165 = arith.constant 0 : index
      %c0_166 = arith.constant 0 : index
      %290 = vector.load %arg37[%c0_165, %c0_166] : memref<20x8xf32, #tpu.memory_space<vmem>>, vector<20x8xf32>
      tpu.vector_store %arg37[%c0_165, %c0_166], %289 {strides = array<i32>} : memref<20x8xf32, #tpu.memory_space<vmem>>, vector<20x8xf32>,
      %c0_167 = arith.constant 0 : index
      %c0_168 = arith.constant 0 : index
      %291 = vector.load %arg3[%c0_167, %c0_168] : memref<2x12xf32, #tpu.memory_space<vmem>>, vector<2x12xf32>
      %c0_169 = arith.constant 0 : index
      %c0_170 = arith.constant 0 : index
      %292 = vector.load %arg38[%c0_169, %c0_170] : memref<2x12xf32, #tpu.memory_space<vmem>>, vector<2x12xf32>
      tpu.vector_store %arg38[%c0_169, %c0_170], %291 {strides = array<i32>} : memref<2x12xf32, #tpu.memory_space<vmem>>, vector<2x12xf32>,
    } else {
    }
    %c0 = arith.constant 0 : index
    %c0_1 = arith.constant 0 : index
    %3 = vector.load %arg36[%c0, %c0_1] : memref<10x16xf32, #tpu.memory_space<vmem>>, vector<10x16xf32>
    %c0_2 = arith.constant 0 : index
    %c0_3 = arith.constant 0 : index
    %4 = vector.load %arg37[%c0_2, %c0_3] : memref<20x8xf32, #tpu.memory_space<vmem>>, vector<20x8xf32>
    %c0_4 = arith.constant 0 : index
    %c0_5 = arith.constant 0 : index
    %5 = vector.load %arg38[%c0_4, %c0_5] : memref<2x12xf32, #tpu.memory_space<vmem>>, vector<2x12xf32>
    %c0_6 = arith.constant 0 : index
    %c0_7 = arith.constant 0 : index
    %c0_8 = arith.constant 0 : index
    %6 = vector.load %arg9[%c0_6, %c0_7, %c0_8] : memref<1x1x16xf32, #tpu.memory_space<vmem>>, vector<1x1x16xf32>
    %7 = vector.shape_cast %6 : vector<1x1x16xf32> to vector<1x16xf32>
    %c0_9 = arith.constant 0 : index
    %c0_10 = arith.constant 0 : index
    %c0_11 = arith.constant 0 : index
    %8 = vector.load %arg10[%c0_9, %c0_10, %c0_11] : memref<1x1x16xf32, #tpu.memory_space<vmem>>, vector<1x1x16xf32>
    %9 = vector.shape_cast %8 : vector<1x1x16xf32> to vector<1x16xf32>
    %cst = arith.constant dense<0.000000e+00> : vector<10xf32>
    %10 = vector.multi_reduction <add>, %3, %cst [1] : vector<10x16xf32> to vector<10xf32>
    %11 = vector.shape_cast %10 : vector<10xf32> to vector<10x1xf32>
    %cst_12 = arith.constant 1.600000e+01 : f32
    %12 = vector.broadcast %cst_12 : f32 to vector<10x1xf32>
    %13 = arith.divf %11, %12 : vector<10x1xf32>
    %14 = vector.broadcast %13 : vector<10x1xf32> to vector<10x16xf32>
    %15 = arith.subf %3, %14 : vector<10x16xf32>
    %16 = arith.mulf %15, %15 : vector<10x16xf32>
    %cst_13 = arith.constant dense<0.000000e+00> : vector<10xf32>
    %17 = vector.multi_reduction <add>, %16, %cst_13 [1] : vector<10x16xf32> to vector<10xf32>
    %18 = vector.shape_cast %17 : vector<10xf32> to vector<10x1xf32>
    %cst_14 = arith.constant 1.600000e+01 : f32
    %19 = vector.broadcast %cst_14 : f32 to vector<10x1xf32>
    %20 = arith.divf %18, %19 : vector<10x1xf32>
    %21 = vector.broadcast %13 : vector<10x1xf32> to vector<10x16xf32>
    %22 = arith.subf %3, %21 : vector<10x16xf32>
    %cst_15 = arith.constant 9.99999974E-6 : f32
    %23 = vector.broadcast %cst_15 : f32 to vector<10x1xf32>
    %24 = arith.addf %20, %23 : vector<10x1xf32>
    %25 = math.rsqrt %24 : vector<10x1xf32>
    %26 = vector.broadcast %25 : vector<10x1xf32> to vector<10x16xf32>
    %27 = arith.mulf %22, %26 : vector<10x16xf32>
    %28 = vector.broadcast %7 : vector<1x16xf32> to vector<10x16xf32>
    %29 = arith.mulf %27, %28 : vector<10x16xf32>
    %30 = vector.broadcast %9 : vector<1x16xf32> to vector<10x16xf32>
    %31 = arith.addf %29, %30 : vector<10x16xf32>
    %cst_16 = arith.constant 0.000000e+00 : f32
    %32 = vector.broadcast %cst_16 : f32 to vector<10x16xf32>
    %33 = arith.maximumf %31, %32 : vector<10x16xf32>
    %c0_17 = arith.constant 0 : index
    %c0_18 = arith.constant 0 : index
    %c0_19 = arith.constant 0 : index
    %34 = vector.load %arg11[%c0_17, %c0_18, %c0_19] : memref<1x1x16xf32, #tpu.memory_space<vmem>>, vector<1x1x16xf32>
    %35 = vector.shape_cast %34 : vector<1x1x16xf32> to vector<1x16xf32>
    %c0_20 = arith.constant 0 : index
    %c0_21 = arith.constant 0 : index
    %c0_22 = arith.constant 0 : index
    %36 = vector.load %arg12[%c0_20, %c0_21, %c0_22] : memref<1x1x16xf32, #tpu.memory_space<vmem>>, vector<1x1x16xf32>
    %37 = vector.shape_cast %36 : vector<1x1x16xf32> to vector<1x16xf32>
    %cst_23 = arith.constant dense<0.000000e+00> : vector<10xf32>
    %38 = vector.multi_reduction <add>, %3, %cst_23 [1] : vector<10x16xf32> to vector<10xf32>
    %39 = vector.shape_cast %38 : vector<10xf32> to vector<10x1xf32>
    %cst_24 = arith.constant 1.600000e+01 : f32
    %40 = vector.broadcast %cst_24 : f32 to vector<10x1xf32>
    %41 = arith.divf %39, %40 : vector<10x1xf32>
    %42 = vector.broadcast %41 : vector<10x1xf32> to vector<10x16xf32>
    %43 = arith.subf %3, %42 : vector<10x16xf32>
    %44 = arith.mulf %43, %43 : vector<10x16xf32>
    %cst_25 = arith.constant dense<0.000000e+00> : vector<10xf32>
    %45 = vector.multi_reduction <add>, %44, %cst_25 [1] : vector<10x16xf32> to vector<10xf32>
    %46 = vector.shape_cast %45 : vector<10xf32> to vector<10x1xf32>
    %cst_26 = arith.constant 1.600000e+01 : f32
    %47 = vector.broadcast %cst_26 : f32 to vector<10x1xf32>
    %48 = arith.divf %46, %47 : vector<10x1xf32>
    %49 = vector.broadcast %41 : vector<10x1xf32> to vector<10x16xf32>
    %50 = arith.subf %3, %49 : vector<10x16xf32>
    %cst_27 = arith.constant 9.99999974E-6 : f32
    %51 = vector.broadcast %cst_27 : f32 to vector<10x1xf32>
    %52 = arith.addf %48, %51 : vector<10x1xf32>
    %53 = math.rsqrt %52 : vector<10x1xf32>
    %54 = vector.broadcast %53 : vector<10x1xf32> to vector<10x16xf32>
    %55 = arith.mulf %50, %54 : vector<10x16xf32>
    %56 = vector.broadcast %35 : vector<1x16xf32> to vector<10x16xf32>
    %57 = arith.mulf %55, %56 : vector<10x16xf32>
    %58 = vector.broadcast %37 : vector<1x16xf32> to vector<10x16xf32>
    %59 = arith.addf %57, %58 : vector<10x16xf32>
    %cst_28 = arith.constant 0.000000e+00 : f32
    %60 = vector.broadcast %cst_28 : f32 to vector<10x16xf32>
    %61 = arith.maximumf %59, %60 : vector<10x16xf32>
    %c0_29 = arith.constant 0 : index
    %c0_30 = arith.constant 0 : index
    %c0_31 = arith.constant 0 : index
    %62 = vector.load %arg13[%c0_29, %c0_30, %c0_31] : memref<1x1x8xf32, #tpu.memory_space<vmem>>, vector<1x1x8xf32>
    %63 = vector.shape_cast %62 : vector<1x1x8xf32> to vector<1x8xf32>
    %c0_32 = arith.constant 0 : index
    %c0_33 = arith.constant 0 : index
    %c0_34 = arith.constant 0 : index
    %64 = vector.load %arg14[%c0_32, %c0_33, %c0_34] : memref<1x1x8xf32, #tpu.memory_space<vmem>>, vector<1x1x8xf32>
    %65 = vector.shape_cast %64 : vector<1x1x8xf32> to vector<1x8xf32>
    %cst_35 = arith.constant dense<0.000000e+00> : vector<20xf32>
    %66 = vector.multi_reduction <add>, %4, %cst_35 [1] : vector<20x8xf32> to vector<20xf32>
    %67 = vector.shape_cast %66 : vector<20xf32> to vector<20x1xf32>
    %cst_36 = arith.constant 8.000000e+00 : f32
    %68 = vector.broadcast %cst_36 : f32 to vector<20x1xf32>
    %69 = arith.divf %67, %68 : vector<20x1xf32>
    %70 = vector.broadcast %69 : vector<20x1xf32> to vector<20x8xf32>
    %71 = arith.subf %4, %70 : vector<20x8xf32>
    %72 = arith.mulf %71, %71 : vector<20x8xf32>
    %cst_37 = arith.constant dense<0.000000e+00> : vector<20xf32>
    %73 = vector.multi_reduction <add>, %72, %cst_37 [1] : vector<20x8xf32> to vector<20xf32>
    %74 = vector.shape_cast %73 : vector<20xf32> to vector<20x1xf32>
    %cst_38 = arith.constant 8.000000e+00 : f32
    %75 = vector.broadcast %cst_38 : f32 to vector<20x1xf32>
    %76 = arith.divf %74, %75 : vector<20x1xf32>
    %77 = vector.broadcast %69 : vector<20x1xf32> to vector<20x8xf32>
    %78 = arith.subf %4, %77 : vector<20x8xf32>
    %cst_39 = arith.constant 9.99999974E-6 : f32
    %79 = vector.broadcast %cst_39 : f32 to vector<20x1xf32>
    %80 = arith.addf %76, %79 : vector<20x1xf32>
    %81 = math.rsqrt %80 : vector<20x1xf32>
    %82 = vector.broadcast %81 : vector<20x1xf32> to vector<20x8xf32>
    %83 = arith.mulf %78, %82 : vector<20x8xf32>
    %84 = vector.broadcast %63 : vector<1x8xf32> to vector<20x8xf32>
    %85 = arith.mulf %83, %84 : vector<20x8xf32>
    %86 = vector.broadcast %65 : vector<1x8xf32> to vector<20x8xf32>
    %87 = arith.addf %85, %86 : vector<20x8xf32>
    %cst_40 = arith.constant 0.000000e+00 : f32
    %88 = vector.broadcast %cst_40 : f32 to vector<20x8xf32>
    %89 = arith.maximumf %87, %88 : vector<20x8xf32>
    %c0_41 = arith.constant 0 : index
    %c0_42 = arith.constant 0 : index
    %c0_43 = arith.constant 0 : index
    %90 = vector.load %arg15[%c0_41, %c0_42, %c0_43] : memref<1x1x12xf32, #tpu.memory_space<vmem>>, vector<1x1x12xf32>
    %91 = vector.shape_cast %90 : vector<1x1x12xf32> to vector<1x12xf32>
    %c0_44 = arith.constant 0 : index
    %c0_45 = arith.constant 0 : index
    %c0_46 = arith.constant 0 : index
    %92 = vector.load %arg16[%c0_44, %c0_45, %c0_46] : memref<1x1x12xf32, #tpu.memory_space<vmem>>, vector<1x1x12xf32>
    %93 = vector.shape_cast %92 : vector<1x1x12xf32> to vector<1x12xf32>
    %cst_47 = arith.constant dense<0.000000e+00> : vector<2xf32>
    %94 = vector.multi_reduction <add>, %5, %cst_47 [1] : vector<2x12xf32> to vector<2xf32>
    %95 = vector.shape_cast %94 : vector<2xf32> to vector<2x1xf32>
    %cst_48 = arith.constant 1.200000e+01 : f32
    %96 = vector.broadcast %cst_48 : f32 to vector<2x1xf32>
    %97 = arith.divf %95, %96 : vector<2x1xf32>
    %98 = vector.broadcast %97 : vector<2x1xf32> to vector<2x12xf32>
    %99 = arith.subf %5, %98 : vector<2x12xf32>
    %100 = arith.mulf %99, %99 : vector<2x12xf32>
    %cst_49 = arith.constant dense<0.000000e+00> : vector<2xf32>
    %101 = vector.multi_reduction <add>, %100, %cst_49 [1] : vector<2x12xf32> to vector<2xf32>
    %102 = vector.shape_cast %101 : vector<2xf32> to vector<2x1xf32>
    %cst_50 = arith.constant 1.200000e+01 : f32
    %103 = vector.broadcast %cst_50 : f32 to vector<2x1xf32>
    %104 = arith.divf %102, %103 : vector<2x1xf32>
    %105 = vector.broadcast %97 : vector<2x1xf32> to vector<2x12xf32>
    %106 = arith.subf %5, %105 : vector<2x12xf32>
    %cst_51 = arith.constant 9.99999974E-6 : f32
    %107 = vector.broadcast %cst_51 : f32 to vector<2x1xf32>
    %108 = arith.addf %104, %107 : vector<2x1xf32>
    %109 = math.rsqrt %108 : vector<2x1xf32>
    %110 = vector.broadcast %109 : vector<2x1xf32> to vector<2x12xf32>
    %111 = arith.mulf %106, %110 : vector<2x12xf32>
    %112 = vector.broadcast %91 : vector<1x12xf32> to vector<2x12xf32>
    %113 = arith.mulf %111, %112 : vector<2x12xf32>
    %114 = vector.broadcast %93 : vector<1x12xf32> to vector<2x12xf32>
    %115 = arith.addf %113, %114 : vector<2x12xf32>
    %cst_52 = arith.constant 0.000000e+00 : f32
    %116 = vector.broadcast %cst_52 : f32 to vector<2x12xf32>
    %117 = arith.maximumf %115, %116 : vector<2x12xf32>
    %c0_53 = arith.constant 0 : index
    %c0_54 = arith.constant 0 : index
    %118 = vector.load %arg4[%c0_53, %c0_54] : memref<20x10xf32, #tpu.memory_space<vmem>>, vector<20x10xf32>
    %cst_55 = arith.constant dense<0.000000e+00> : vector<20x16xf32>
    %119 = tpu.matmul %118, %33, %cst_55 {dimension_numbers = #tpu.dot_dimension_numbers<[1], [0], [0], [1], [0, 0, 1, 1], [], []>} : vector<20x10xf32>, vector<10x16xf32>, vector<20x16xf32> -> vector<20x16xf32>
    %c0_56 = arith.constant 0 : index
    %c0_57 = arith.constant 0 : index
    %120 = vector.load %arg5[%c0_56, %c0_57] : memref<20x10xf32, #tpu.memory_space<vmem>>, vector<20x10xf32>
    %cst_58 = arith.constant dense<0.000000e+00> : vector<20x16xf32>
    %121 = tpu.matmul %120, %61, %cst_58 {dimension_numbers = #tpu.dot_dimension_numbers<[1], [0], [0], [1], [0, 0, 1, 1], [], []>} : vector<20x10xf32>, vector<10x16xf32>, vector<20x16xf32> -> vector<20x16xf32>
    %c0_59 = arith.constant 0 : index
    %c0_60 = arith.constant 0 : index
    %122 = vector.load %arg6[%c0_59, %c0_60] : memref<20x2xf32, #tpu.memory_space<vmem>>, vector<20x2xf32>
    %cst_61 = arith.constant dense<0.000000e+00> : vector<20x12xf32>
    %123 = tpu.matmul %122, %117, %cst_61 {dimension_numbers = #tpu.dot_dimension_numbers<[1], [0], [0], [1], [0, 0, 1, 1], [], []>} : vector<20x2xf32>, vector<2x12xf32>, vector<20x12xf32> -> vector<20x12xf32>
    %124 = tpu.concatenate %119, %121, %89, %123 in 1 : vector<20x16xf32>, vector<20x16xf32>, vector<20x8xf32>, vector<20x12xf32> -> vector<20x52xf32>
    %c0_62 = arith.constant 0 : index
    %c0_63 = arith.constant 0 : index
    %c0_64 = arith.constant 0 : index
    %125 = vector.load %arg17[%c0_62, %c0_63, %c0_64] : memref<1x52x32xf32, #tpu.memory_space<vmem>>, vector<1x52x32xf32>
    %126 = vector.shape_cast %125 : vector<1x52x32xf32> to vector<52x32xf32>
    %cst_65 = arith.constant dense<0.000000e+00> : vector<20x32xf32>
    %127 = tpu.matmul %124, %126, %cst_65 {dimension_numbers = #tpu.dot_dimension_numbers<[1], [0], [0], [1], [0, 0, 1, 1], [], []>} : vector<20x52xf32>, vector<52x32xf32>, vector<20x32xf32> -> vector<20x32xf32>
    %c0_66 = arith.constant 0 : index
    %c0_67 = arith.constant 0 : index
    %c0_68 = arith.constant 0 : index
    %128 = vector.load %arg18[%c0_66, %c0_67, %c0_68] : memref<1x1x32xf32, #tpu.memory_space<vmem>>, vector<1x1x32xf32>
    %129 = vector.shape_cast %128 : vector<1x1x32xf32> to vector<1x32xf32>
    %130 = vector.broadcast %129 : vector<1x32xf32> to vector<20x32xf32>
    %131 = arith.addf %127, %130 : vector<20x32xf32>
    %c0_69 = arith.constant 0 : index
    %c0_70 = arith.constant 0 : index
    %c0_71 = arith.constant 0 : index
    %132 = vector.load %arg19[%c0_69, %c0_70, %c0_71] : memref<1x1x32xf32, #tpu.memory_space<vmem>>, vector<1x1x32xf32>
    %133 = vector.shape_cast %132 : vector<1x1x32xf32> to vector<1x32xf32>
    %c0_72 = arith.constant 0 : index
    %c0_73 = arith.constant 0 : index
    %c0_74 = arith.constant 0 : index
    %134 = vector.load %arg20[%c0_72, %c0_73, %c0_74] : memref<1x1x32xf32, #tpu.memory_space<vmem>>, vector<1x1x32xf32>
    %135 = vector.shape_cast %134 : vector<1x1x32xf32> to vector<1x32xf32>
    %cst_75 = arith.constant dense<0.000000e+00> : vector<20xf32>
    %136 = vector.multi_reduction <add>, %131, %cst_75 [1] : vector<20x32xf32> to vector<20xf32>
    %137 = vector.shape_cast %136 : vector<20xf32> to vector<20x1xf32>
    %cst_76 = arith.constant 3.200000e+01 : f32
    %138 = vector.broadcast %cst_76 : f32 to vector<20x1xf32>
    %139 = arith.divf %137, %138 : vector<20x1xf32>
    %140 = vector.broadcast %139 : vector<20x1xf32> to vector<20x32xf32>
    %141 = arith.subf %131, %140 : vector<20x32xf32>
    %142 = arith.mulf %141, %141 : vector<20x32xf32>
    %cst_77 = arith.constant dense<0.000000e+00> : vector<20xf32>
    %143 = vector.multi_reduction <add>, %142, %cst_77 [1] : vector<20x32xf32> to vector<20xf32>
    %144 = vector.shape_cast %143 : vector<20xf32> to vector<20x1xf32>
    %cst_78 = arith.constant 3.200000e+01 : f32
    %145 = vector.broadcast %cst_78 : f32 to vector<20x1xf32>
    %146 = arith.divf %144, %145 : vector<20x1xf32>
    %147 = vector.broadcast %139 : vector<20x1xf32> to vector<20x32xf32>
    %148 = arith.subf %131, %147 : vector<20x32xf32>
    %cst_79 = arith.constant 9.99999974E-6 : f32
    %149 = vector.broadcast %cst_79 : f32 to vector<20x1xf32>
    %150 = arith.addf %146, %149 : vector<20x1xf32>
    %151 = math.rsqrt %150 : vector<20x1xf32>
    %152 = vector.broadcast %151 : vector<20x1xf32> to vector<20x32xf32>
    %153 = arith.mulf %148, %152 : vector<20x32xf32>
    %154 = vector.broadcast %133 : vector<1x32xf32> to vector<20x32xf32>
    %155 = arith.mulf %153, %154 : vector<20x32xf32>
    %156 = vector.broadcast %135 : vector<1x32xf32> to vector<20x32xf32>
    %157 = arith.addf %155, %156 : vector<20x32xf32>
    %cst_80 = arith.constant 0.000000e+00 : f32
    %158 = vector.broadcast %cst_80 : f32 to vector<20x32xf32>
    %159 = arith.maximumf %157, %158 : vector<20x32xf32>
    %c0_81 = arith.constant 0 : index
    %c0_82 = arith.constant 0 : index
    %c0_83 = arith.constant 0 : index
    %160 = vector.load %arg21[%c0_81, %c0_82, %c0_83] : memref<1x32x8xf32, #tpu.memory_space<vmem>>, vector<1x32x8xf32>
    %161 = vector.shape_cast %160 : vector<1x32x8xf32> to vector<32x8xf32>
    %cst_84 = arith.constant dense<0.000000e+00> : vector<20x8xf32>
    %162 = tpu.matmul %159, %161, %cst_84 {dimension_numbers = #tpu.dot_dimension_numbers<[1], [0], [0], [1], [0, 0, 1, 1], [], []>} : vector<20x32xf32>, vector<32x8xf32>, vector<20x8xf32> -> vector<20x8xf32>
    %163 = arith.addf %4, %162 : vector<20x8xf32>
    %c0_85 = arith.constant 0 : index
    %c0_86 = arith.constant 0 : index
    %c0_87 = arith.constant 0 : index
    %164 = vector.load %arg22[%c0_85, %c0_86, %c0_87] : memref<1x1x8xf32, #tpu.memory_space<vmem>>, vector<1x1x8xf32>
    %165 = vector.shape_cast %164 : vector<1x1x8xf32> to vector<1x8xf32>
    %166 = vector.broadcast %165 : vector<1x8xf32> to vector<20x8xf32>
    %167 = arith.addf %163, %166 : vector<20x8xf32>
    %c0_88 = arith.constant 0 : index
    %c0_89 = arith.constant 0 : index
    %168 = vector.load %arg7[%c0_88, %c0_89] : memref<10x20xf32, #tpu.memory_space<vmem>>, vector<10x20xf32>
    %cst_90 = arith.constant dense<0.000000e+00> : vector<10x8xf32>
    %169 = tpu.matmul %168, %167, %cst_90 {dimension_numbers = #tpu.dot_dimension_numbers<[1], [0], [0], [1], [0, 0, 1, 1], [], []>} : vector<10x20xf32>, vector<20x8xf32>, vector<10x8xf32> -> vector<10x8xf32>
    %c0_91 = arith.constant 0 : index
    %c0_92 = arith.constant 0 : index
    %c0_93 = arith.constant 0 : index
    %170 = vector.load %arg23[%c0_91, %c0_92, %c0_93] : memref<1x1x16xf32, #tpu.memory_space<vmem>>, vector<1x1x16xf32>
    %171 = vector.shape_cast %170 : vector<1x1x16xf32> to vector<1x16xf32>
    %c0_94 = arith.constant 0 : index
    %c0_95 = arith.constant 0 : index
    %c0_96 = arith.constant 0 : index
    %172 = vector.load %arg24[%c0_94, %c0_95, %c0_96] : memref<1x1x16xf32, #tpu.memory_space<vmem>>, vector<1x1x16xf32>
    %173 = vector.shape_cast %172 : vector<1x1x16xf32> to vector<1x16xf32>
    %cst_97 = arith.constant dense<0.000000e+00> : vector<10xf32>
    %174 = vector.multi_reduction <add>, %3, %cst_97 [1] : vector<10x16xf32> to vector<10xf32>
    %175 = vector.shape_cast %174 : vector<10xf32> to vector<10x1xf32>
    %cst_98 = arith.constant 1.600000e+01 : f32
    %176 = vector.broadcast %cst_98 : f32 to vector<10x1xf32>
    %177 = arith.divf %175, %176 : vector<10x1xf32>
    %178 = vector.broadcast %177 : vector<10x1xf32> to vector<10x16xf32>
    %179 = arith.subf %3, %178 : vector<10x16xf32>
    %180 = arith.mulf %179, %179 : vector<10x16xf32>
    %cst_99 = arith.constant dense<0.000000e+00> : vector<10xf32>
    %181 = vector.multi_reduction <add>, %180, %cst_99 [1] : vector<10x16xf32> to vector<10xf32>
    %182 = vector.shape_cast %181 : vector<10xf32> to vector<10x1xf32>
    %cst_100 = arith.constant 1.600000e+01 : f32
    %183 = vector.broadcast %cst_100 : f32 to vector<10x1xf32>
    %184 = arith.divf %182, %183 : vector<10x1xf32>
    %185 = vector.broadcast %177 : vector<10x1xf32> to vector<10x16xf32>
    %186 = arith.subf %3, %185 : vector<10x16xf32>
    %cst_101 = arith.constant 9.99999974E-6 : f32
    %187 = vector.broadcast %cst_101 : f32 to vector<10x1xf32>
    %188 = arith.addf %184, %187 : vector<10x1xf32>
    %189 = math.rsqrt %188 : vector<10x1xf32>
    %190 = vector.broadcast %189 : vector<10x1xf32> to vector<10x16xf32>
    %191 = arith.mulf %186, %190 : vector<10x16xf32>
    %192 = vector.broadcast %171 : vector<1x16xf32> to vector<10x16xf32>
    %193 = arith.mulf %191, %192 : vector<10x16xf32>
    %194 = vector.broadcast %173 : vector<1x16xf32> to vector<10x16xf32>
    %195 = arith.addf %193, %194 : vector<10x16xf32>
    %cst_102 = arith.constant 0.000000e+00 : f32
    %196 = vector.broadcast %cst_102 : f32 to vector<10x16xf32>
    %197 = arith.maximumf %195, %196 : vector<10x16xf32>
    %c0_103 = arith.constant 0 : index
    %c0_104 = arith.constant 0 : index
    %c0_105 = arith.constant 0 : index
    %198 = vector.load %arg25[%c0_103, %c0_104, %c0_105] : memref<1x1x8xf32, #tpu.memory_space<vmem>>, vector<1x1x8xf32>
    %199 = vector.shape_cast %198 : vector<1x1x8xf32> to vector<1x8xf32>
    %c0_106 = arith.constant 0 : index
    %c0_107 = arith.constant 0 : index
    %c0_108 = arith.constant 0 : index
    %200 = vector.load %arg26[%c0_106, %c0_107, %c0_108] : memref<1x1x8xf32, #tpu.memory_space<vmem>>, vector<1x1x8xf32>
    %201 = vector.shape_cast %200 : vector<1x1x8xf32> to vector<1x8xf32>
    %cst_109 = arith.constant dense<0.000000e+00> : vector<10xf32>
    %202 = vector.multi_reduction <add>, %169, %cst_109 [1] : vector<10x8xf32> to vector<10xf32>
    %203 = vector.shape_cast %202 : vector<10xf32> to vector<10x1xf32>
    %cst_110 = arith.constant 8.000000e+00 : f32
    %204 = vector.broadcast %cst_110 : f32 to vector<10x1xf32>
    %205 = arith.divf %203, %204 : vector<10x1xf32>
    %206 = vector.broadcast %205 : vector<10x1xf32> to vector<10x8xf32>
    %207 = arith.subf %169, %206 : vector<10x8xf32>
    %208 = arith.mulf %207, %207 : vector<10x8xf32>
    %cst_111 = arith.constant dense<0.000000e+00> : vector<10xf32>
    %209 = vector.multi_reduction <add>, %208, %cst_111 [1] : vector<10x8xf32> to vector<10xf32>
    %210 = vector.shape_cast %209 : vector<10xf32> to vector<10x1xf32>
    %cst_112 = arith.constant 8.000000e+00 : f32
    %211 = vector.broadcast %cst_112 : f32 to vector<10x1xf32>
    %212 = arith.divf %210, %211 : vector<10x1xf32>
    %213 = vector.broadcast %205 : vector<10x1xf32> to vector<10x8xf32>
    %214 = arith.subf %169, %213 : vector<10x8xf32>
    %cst_113 = arith.constant 9.99999974E-6 : f32
    %215 = vector.broadcast %cst_113 : f32 to vector<10x1xf32>
    %216 = arith.addf %212, %215 : vector<10x1xf32>
    %217 = math.rsqrt %216 : vector<10x1xf32>
    %218 = vector.broadcast %217 : vector<10x1xf32> to vector<10x8xf32>
    %219 = arith.mulf %214, %218 : vector<10x8xf32>
    %220 = vector.broadcast %199 : vector<1x8xf32> to vector<10x8xf32>
    %221 = arith.mulf %219, %220 : vector<10x8xf32>
    %222 = vector.broadcast %201 : vector<1x8xf32> to vector<10x8xf32>
    %223 = arith.addf %221, %222 : vector<10x8xf32>
    %cst_114 = arith.constant 0.000000e+00 : f32
    %224 = vector.broadcast %cst_114 : f32 to vector<10x8xf32>
    %225 = arith.maximumf %223, %224 : vector<10x8xf32>
    %226 = tpu.concatenate %197, %225 in 1 : vector<10x16xf32>, vector<10x8xf32> -> vector<10x24xf32>
    %c0_115 = arith.constant 0 : index
    %c0_116 = arith.constant 0 : index
    %c0_117 = arith.constant 0 : index
    %227 = vector.load %arg27[%c0_115, %c0_116, %c0_117] : memref<1x24x32xf32, #tpu.memory_space<vmem>>, vector<1x24x32xf32>
    %228 = vector.shape_cast %227 : vector<1x24x32xf32> to vector<24x32xf32>
    %cst_118 = arith.constant dense<0.000000e+00> : vector<10x32xf32>
    %229 = tpu.matmul %226, %228, %cst_118 {dimension_numbers = #tpu.dot_dimension_numbers<[1], [0], [0], [1], [0, 0, 1, 1], [], []>} : vector<10x24xf32>, vector<24x32xf32>, vector<10x32xf32> -> vector<10x32xf32>
    %c0_119 = arith.constant 0 : index
    %c0_120 = arith.constant 0 : index
    %c0_121 = arith.constant 0 : index
    %230 = vector.load %arg28[%c0_119, %c0_120, %c0_121] : memref<1x1x32xf32, #tpu.memory_space<vmem>>, vector<1x1x32xf32>
    %231 = vector.shape_cast %230 : vector<1x1x32xf32> to vector<1x32xf32>
    %232 = vector.broadcast %231 : vector<1x32xf32> to vector<10x32xf32>
    %233 = arith.addf %229, %232 : vector<10x32xf32>
    %c0_122 = arith.constant 0 : index
    %c0_123 = arith.constant 0 : index
    %c0_124 = arith.constant 0 : index
    %234 = vector.load %arg29[%c0_122, %c0_123, %c0_124] : memref<1x1x32xf32, #tpu.memory_space<vmem>>, vector<1x1x32xf32>
    %235 = vector.shape_cast %234 : vector<1x1x32xf32> to vector<1x32xf32>
    %c0_125 = arith.constant 0 : index
    %c0_126 = arith.constant 0 : index
    %c0_127 = arith.constant 0 : index
    %236 = vector.load %arg30[%c0_125, %c0_126, %c0_127] : memref<1x1x32xf32, #tpu.memory_space<vmem>>, vector<1x1x32xf32>
    %237 = vector.shape_cast %236 : vector<1x1x32xf32> to vector<1x32xf32>
    %cst_128 = arith.constant dense<0.000000e+00> : vector<10xf32>
    %238 = vector.multi_reduction <add>, %233, %cst_128 [1] : vector<10x32xf32> to vector<10xf32>
    %239 = vector.shape_cast %238 : vector<10xf32> to vector<10x1xf32>
    %cst_129 = arith.constant 3.200000e+01 : f32
    %240 = vector.broadcast %cst_129 : f32 to vector<10x1xf32>
    %241 = arith.divf %239, %240 : vector<10x1xf32>
    %242 = vector.broadcast %241 : vector<10x1xf32> to vector<10x32xf32>
    %243 = arith.subf %233, %242 : vector<10x32xf32>
    %244 = arith.mulf %243, %243 : vector<10x32xf32>
    %cst_130 = arith.constant dense<0.000000e+00> : vector<10xf32>
    %245 = vector.multi_reduction <add>, %244, %cst_130 [1] : vector<10x32xf32> to vector<10xf32>
    %246 = vector.shape_cast %245 : vector<10xf32> to vector<10x1xf32>
    %cst_131 = arith.constant 3.200000e+01 : f32
    %247 = vector.broadcast %cst_131 : f32 to vector<10x1xf32>
    %248 = arith.divf %246, %247 : vector<10x1xf32>
    %249 = vector.broadcast %241 : vector<10x1xf32> to vector<10x32xf32>
    %250 = arith.subf %233, %249 : vector<10x32xf32>
    %cst_132 = arith.constant 9.99999974E-6 : f32
    %251 = vector.broadcast %cst_132 : f32 to vector<10x1xf32>
    %252 = arith.addf %248, %251 : vector<10x1xf32>
    %253 = math.rsqrt %252 : vector<10x1xf32>
    %254 = vector.broadcast %253 : vector<10x1xf32> to vector<10x32xf32>
    %255 = arith.mulf %250, %254 : vector<10x32xf32>
    %256 = vector.broadcast %235 : vector<1x32xf32> to vector<10x32xf32>
    %257 = arith.mulf %255, %256 : vector<10x32xf32>
    %258 = vector.broadcast %237 : vector<1x32xf32> to vector<10x32xf32>
    %259 = arith.addf %257, %258 : vector<10x32xf32>
    %cst_133 = arith.constant 0.000000e+00 : f32
    %260 = vector.broadcast %cst_133 : f32 to vector<10x32xf32>
    %261 = arith.maximumf %259, %260 : vector<10x32xf32>
    %c0_134 = arith.constant 0 : index
    %c0_135 = arith.constant 0 : index
    %c0_136 = arith.constant 0 : index
    %262 = vector.load %arg31[%c0_134, %c0_135, %c0_136] : memref<1x32x28xf32, #tpu.memory_space<vmem>>, vector<1x32x28xf32>
    %263 = vector.shape_cast %262 : vector<1x32x28xf32> to vector<32x28xf32>
    %cst_137 = arith.constant dense<0.000000e+00> : vector<10x28xf32>
    %264 = tpu.matmul %261, %263, %cst_137 {dimension_numbers = #tpu.dot_dimension_numbers<[1], [0], [0], [1], [0, 0, 1, 1], [], []>} : vector<10x32xf32>, vector<32x28xf32>, vector<10x28xf32> -> vector<10x28xf32>
    %c0_138 = arith.constant 0 : index
    %c0_139 = arith.constant 0 : index
    %c0_140 = arith.constant 0 : index
    %265 = vector.load %arg32[%c0_138, %c0_139, %c0_140] : memref<1x1x28xf32, #tpu.memory_space<vmem>>, vector<1x1x28xf32>
    %266 = vector.shape_cast %265 : vector<1x1x28xf32> to vector<1x28xf32>
    %267 = vector.broadcast %266 : vector<1x28xf32> to vector<10x28xf32>
    %268 = arith.addf %264, %267 : vector<10x28xf32>
    %269 = vector.extract_strided_slice %268 {offsets = [0, 0], sizes = [10, 16], strides = [1, 1]} : vector<10x28xf32> to vector<10x16xf32>
    %270 = vector.extract_strided_slice %268 {offsets = [0, 16], sizes = [10, 12], strides = [1, 1]} : vector<10x28xf32> to vector<10x12xf32>
    %271 = arith.addf %3, %269 : vector<10x16xf32>
    %c0_141 = arith.constant 0 : index
    %c0_142 = arith.constant 0 : index
    %272 = vector.load %arg8[%c0_141, %c0_142] : memref<2x10xf32, #tpu.memory_space<vmem>>, vector<2x10xf32>
    %cst_143 = arith.constant dense<0.000000e+00> : vector<2x12xf32>
    %273 = tpu.matmul %272, %270, %cst_143 {dimension_numbers = #tpu.dot_dimension_numbers<[1], [0], [0], [1], [0, 0, 1, 1], [], []>} : vector<2x10xf32>, vector<10x12xf32>, vector<2x12xf32> -> vector<2x12xf32>
    %274 = arith.addf %5, %273 : vector<2x12xf32>
    %c0_144 = arith.constant 0 : index
    %c0_145 = arith.constant 0 : index
    %275 = vector.load %arg36[%c0_144, %c0_145] : memref<10x16xf32, #tpu.memory_space<vmem>>, vector<10x16xf32>
    tpu.vector_store %arg36[%c0_144, %c0_145], %271 {strides = array<i32>} : memref<10x16xf32, #tpu.memory_space<vmem>>, vector<10x16xf32>,
    %c0_146 = arith.constant 0 : index
    %c0_147 = arith.constant 0 : index
    %276 = vector.load %arg37[%c0_146, %c0_147] : memref<20x8xf32, #tpu.memory_space<vmem>>, vector<20x8xf32>
    tpu.vector_store %arg37[%c0_146, %c0_147], %167 {strides = array<i32>} : memref<20x8xf32, #tpu.memory_space<vmem>>, vector<20x8xf32>,
    %c0_148 = arith.constant 0 : index
    %c0_149 = arith.constant 0 : index
    %277 = vector.load %arg38[%c0_148, %c0_149] : memref<2x12xf32, #tpu.memory_space<vmem>>, vector<2x12xf32>
    tpu.vector_store %arg38[%c0_148, %c0_149], %274 {strides = array<i32>} : memref<2x12xf32, #tpu.memory_space<vmem>>, vector<2x12xf32>,
    %cst_150 = arith.constant 0.000000e+00 : f32
    %278 = vector.broadcast %cst_150 : f32 to vector<10x112xf32>
    %279 = tpu.concatenate %271, %278 in 1 : vector<10x16xf32>, vector<10x112xf32> -> vector<10x128xf32>
    %c0_151 = arith.constant 0 : index
    %c0_152 = arith.constant 0 : index
    %280 = vector.load %arg33[%c0_151, %c0_152] : memref<10x128xf32, #tpu.memory_space<vmem>>, vector<10x128xf32>
    tpu.vector_store %arg33[%c0_151, %c0_152], %279 {strides = array<i32>} : memref<10x128xf32, #tpu.memory_space<vmem>>, vector<10x128xf32>,
    %cst_153 = arith.constant 0.000000e+00 : f32
    %281 = vector.broadcast %cst_153 : f32 to vector<20x120xf32>
    %282 = tpu.concatenate %167, %281 in 1 : vector<20x8xf32>, vector<20x120xf32> -> vector<20x128xf32>
    %c0_154 = arith.constant 0 : index
    %c0_155 = arith.constant 0 : index
    %283 = vector.load %arg34[%c0_154, %c0_155] : memref<20x128xf32, #tpu.memory_space<vmem>>, vector<20x128xf32>
    tpu.vector_store %arg34[%c0_154, %c0_155], %282 {strides = array<i32>} : memref<20x128xf32, #tpu.memory_space<vmem>>, vector<20x128xf32>,
    %cst_156 = arith.constant 0.000000e+00 : f32
    %284 = vector.broadcast %cst_156 : f32 to vector<2x116xf32>
    %285 = tpu.concatenate %274, %284 in 1 : vector<2x12xf32>, vector<2x116xf32> -> vector<2x128xf32>
    %c0_157 = arith.constant 0 : index
    %c0_158 = arith.constant 0 : index
    %286 = vector.load %arg35[%c0_157, %c0_158] : memref<2x128xf32, #tpu.memory_space<vmem>>, vector<2x128xf32>
    tpu.vector_store %arg35[%c0_157, %c0_158], %285 {strides = array<i32>} : memref<2x128xf32, #tpu.memory_space<vmem>>, vector<2x128xf32>,
    return
  }
  func.func @transform_0(%arg0: i32) -> (i32, i32) {
    %c0_i32 = arith.constant 0 : i32
    %c0_i32_0 = arith.constant 0 : i32
    %c0_i32_1 = arith.constant 0 : i32
    return %c0_i32, %c0_i32_0 : i32, i32
  }
  func.func @transform_1(%arg0: i32) -> (i32, i32) {
    %c0_i32 = arith.constant 0 : i32
    %c0_i32_0 = arith.constant 0 : i32
    %c0_i32_1 = arith.constant 0 : i32
    return %c0_i32, %c0_i32_0 : i32, i32
  }
  func.func @transform_2(%arg0: i32) -> (i32, i32) {
    %c0_i32 = arith.constant 0 : i32
    %c0_i32_0 = arith.constant 0 : i32
    %c0_i32_1 = arith.constant 0 : i32
    return %c0_i32, %c0_i32_0 : i32, i32
  }
  func.func @transform_3(%arg0: i32) -> (i32, i32) {
    %c0_i32 = arith.constant 0 : i32
    %c0_i32_0 = arith.constant 0 : i32
    %c0_i32_1 = arith.constant 0 : i32
    return %c0_i32, %c0_i32_0 : i32, i32
  }
  func.func @transform_4(%arg0: i32) -> (i32, i32) {
    %c0_i32 = arith.constant 0 : i32
    %c0_i32_0 = arith.constant 0 : i32
    %c0_i32_1 = arith.constant 0 : i32
    return %c0_i32, %c0_i32_0 : i32, i32
  }
  func.func @transform_5(%arg0: i32) -> (i32, i32) {
    %c0_i32 = arith.constant 0 : i32
    %c0_i32_0 = arith.constant 0 : i32
    %c0_i32_1 = arith.constant 0 : i32
    return %c0_i32, %c0_i32_0 : i32, i32
  }
  func.func @transform_6(%arg0: i32) -> (i32, i32) {
    %c0_i32 = arith.constant 0 : i32
    %c0_i32_0 = arith.constant 0 : i32
    %c0_i32_1 = arith.constant 0 : i32
    return %c0_i32, %c0_i32_0 : i32, i32
  }
  func.func @transform_7(%arg0: i32) -> (i32, i32) {
    %c0_i32 = arith.constant 0 : i32
    %c0_i32_0 = arith.constant 0 : i32
    %c0_i32_1 = arith.constant 0 : i32
    return %c0_i32, %c0_i32_0 : i32, i32
  }
  func.func @transform_8(%arg0: i32) -> (i32, i32, i32) {
    %c0_i32 = arith.constant 0 : i32
    %c0_i32_0 = arith.constant 0 : i32
    %c0_i32_1 = arith.constant 0 : i32
    return %arg0, %c0_i32, %c0_i32_0 : i32, i32, i32
  }
  func.func @transform_9(%arg0: i32) -> (i32, i32, i32) {
    %c0_i32 = arith.constant 0 : i32
    %c0_i32_0 = arith.constant 0 : i32
    %c0_i32_1 = arith.constant 0 : i32
    return %arg0, %c0_i32, %c0_i32_0 : i32, i32, i32
  }
  func.func @transform_10(%arg0: i32) -> (i32, i32, i32) {
    %c0_i32 = arith.constant 0 : i32
    %c0_i32_0 = arith.constant 0 : i32
    %c0_i32_1 = arith.constant 0 : i32
    return %arg0, %c0_i32, %c0_i32_0 : i32, i32, i32
  }
  func.func @transform_11(%arg0: i32) -> (i32, i32, i32) {
    %c0_i32 = arith.constant 0 : i32
    %c0_i32_0 = arith.constant 0 : i32
    %c0_i32_1 = arith.constant 0 : i32
    return %arg0, %c0_i32, %c0_i32_0 : i32, i32, i32
  }
  func.func @transform_12(%arg0: i32) -> (i32, i32, i32) {
    %c0_i32 = arith.constant 0 : i32
    %c0_i32_0 = arith.constant 0 : i32
    %c0_i32_1 = arith.constant 0 : i32
    return %arg0, %c0_i32, %c0_i32_0 : i32, i32, i32
  }
  func.func @transform_13(%arg0: i32) -> (i32, i32, i32) {
    %c0_i32 = arith.constant 0 : i32
    %c0_i32_0 = arith.constant 0 : i32
    %c0_i32_1 = arith.constant 0 : i32
    return %arg0, %c0_i32, %c0_i32_0 : i32, i32, i32
  }
  func.func @transform_14(%arg0: i32) -> (i32, i32, i32) {
    %c0_i32 = arith.constant 0 : i32
    %c0_i32_0 = arith.constant 0 : i32
    %c0_i32_1 = arith.constant 0 : i32
    return %arg0, %c0_i32, %c0_i32_0 : i32, i32, i32
  }
  func.func @transform_15(%arg0: i32) -> (i32, i32, i32) {
    %c0_i32 = arith.constant 0 : i32
    %c0_i32_0 = arith.constant 0 : i32
    %c0_i32_1 = arith.constant 0 : i32
    return %arg0, %c0_i32, %c0_i32_0 : i32, i32, i32
  }
  func.func @transform_16(%arg0: i32) -> (i32, i32, i32) {
    %c0_i32 = arith.constant 0 : i32
    %c0_i32_0 = arith.constant 0 : i32
    %c0_i32_1 = arith.constant 0 : i32
    return %arg0, %c0_i32, %c0_i32_0 : i32, i32, i32
  }
  func.func @transform_17(%arg0: i32) -> (i32, i32, i32) {
    %c0_i32 = arith.constant 0 : i32
    %c0_i32_0 = arith.constant 0 : i32
    %c0_i32_1 = arith.constant 0 : i32
    return %arg0, %c0_i32, %c0_i32_0 : i32, i32, i32
  }
  func.func @transform_18(%arg0: i32) -> (i32, i32, i32) {
    %c0_i32 = arith.constant 0 : i32
    %c0_i32_0 = arith.constant 0 : i32
    %c0_i32_1 = arith.constant 0 : i32
    return %arg0, %c0_i32, %c0_i32_0 : i32, i32, i32
  }
  func.func @transform_19(%arg0: i32) -> (i32, i32, i32) {
    %c0_i32 = arith.constant 0 : i32
    %c0_i32_0 = arith.constant 0 : i32
    %c0_i32_1 = arith.constant 0 : i32
    return %arg0, %c0_i32, %c0_i32_0 : i32, i32, i32
  }
  func.func @transform_20(%arg0: i32) -> (i32, i32, i32) {
    %c0_i32 = arith.constant 0 : i32
    %c0_i32_0 = arith.constant 0 : i32
    %c0_i32_1 = arith.constant 0 : i32
    return %arg0, %c0_i32, %c0_i32_0 : i32, i32, i32
  }
  func.func @transform_21(%arg0: i32) -> (i32, i32, i32) {
    %c0_i32 = arith.constant 0 : i32
    %c0_i32_0 = arith.constant 0 : i32
    %c0_i32_1 = arith.constant 0 : i32
    return %arg0, %c0_i32, %c0_i32_0 : i32, i32, i32
  }
  func.func @transform_22(%arg0: i32) -> (i32, i32, i32) {
    %c0_i32 = arith.constant 0 : i32
    %c0_i32_0 = arith.constant 0 : i32
    %c0_i32_1 = arith.constant 0 : i32
    return %arg0, %c0_i32, %c0_i32_0 : i32, i32, i32
  }
  func.func @transform_23(%arg0: i32) -> (i32, i32, i32) {
    %c0_i32 = arith.constant 0 : i32
    %c0_i32_0 = arith.constant 0 : i32
    %c0_i32_1 = arith.constant 0 : i32
    return %arg0, %c0_i32, %c0_i32_0 : i32, i32, i32
  }
  func.func @transform_24(%arg0: i32) -> (i32, i32, i32) {
    %c0_i32 = arith.constant 0 : i32
    %c0_i32_0 = arith.constant 0 : i32
    %c0_i32_1 = arith.constant 0 : i32
    return %arg0, %c0_i32, %c0_i32_0 : i32, i32, i32
  }
  func.func @transform_25(%arg0: i32) -> (i32, i32, i32) {
    %c0_i32 = arith.constant 0 : i32
    %c0_i32_0 = arith.constant 0 : i32
    %c0_i32_1 = arith.constant 0 : i32
    return %arg0, %c0_i32, %c0_i32_0 : i32, i32, i32
  }
  func.func @transform_26(%arg0: i32) -> (i32, i32, i32) {
    %c0_i32 = arith.constant 0 : i32
    %c0_i32_0 = arith.constant 0 : i32
    %c0_i32_1 = arith.constant 0 : i32
    return %arg0, %c0_i32, %c0_i32_0 : i32, i32, i32
  }
  func.func @transform_27(%arg0: i32) -> (i32, i32, i32) {
    %c0_i32 = arith.constant 0 : i32
    %c0_i32_0 = arith.constant 0 : i32
    %c0_i32_1 = arith.constant 0 : i32
    return %arg0, %c0_i32, %c0_i32_0 : i32, i32, i32
  }
  func.func @transform_28(%arg0: i32) -> (i32, i32, i32) {
    %c0_i32 = arith.constant 0 : i32
    %c0_i32_0 = arith.constant 0 : i32
    %c0_i32_1 = arith.constant 0 : i32
    return %arg0, %c0_i32, %c0_i32_0 : i32, i32, i32
  }
  func.func @transform_29(%arg0: i32) -> (i32, i32, i32) {
    %c0_i32 = arith.constant 0 : i32
    %c0_i32_0 = arith.constant 0 : i32
    %c0_i32_1 = arith.constant 0 : i32
    return %arg0, %c0_i32, %c0_i32_0 : i32, i32, i32
  }
  func.func @transform_30(%arg0: i32) -> (i32, i32, i32) {
    %c0_i32 = arith.constant 0 : i32
    %c0_i32_0 = arith.constant 0 : i32
    %c0_i32_1 = arith.constant 0 : i32
    return %arg0, %c0_i32, %c0_i32_0 : i32, i32, i32
  }
  func.func @transform_31(%arg0: i32) -> (i32, i32, i32) {
    %c0_i32 = arith.constant 0 : i32
    %c0_i32_0 = arith.constant 0 : i32
    %c0_i32_1 = arith.constant 0 : i32
    return %arg0, %c0_i32, %c0_i32_0 : i32, i32, i32
  }
  func.func @transform_32(%arg0: i32) -> (i32, i32) {
    %c0_i32 = arith.constant 0 : i32
    %c0_i32_0 = arith.constant 0 : i32
    %c0_i32_1 = arith.constant 0 : i32
    return %c0_i32, %c0_i32_0 : i32, i32
  }
  func.func @transform_33(%arg0: i32) -> (i32, i32) {
    %c0_i32 = arith.constant 0 : i32
    %c0_i32_0 = arith.constant 0 : i32
    %c0_i32_1 = arith.constant 0 : i32
    return %c0_i32, %c0_i32_0 : i32, i32
  }
  func.func @transform_34(%arg0: i32) -> (i32, i32) {
    %c0_i32 = arith.constant 0 : i32
    %c0_i32_0 = arith.constant 0 : i32
    %c0_i32_1 = arith.constant 0 : i32
    return %c0_i32, %c0_i32_0 : i32, i32
  }
}

</mosaic_0001>

<bundles_post_ra>
// kernel: tpu_custom_call.1
= control target key start
LH: loop header
LB: loop body
LE: loop exit
PB: predicated region body
PF: predicated region fallthrough
CT: control target
= control target key end

     0   :  { %s2910_s6 = smov 1   ;;  %s2911_s10 = smov 2   ;;  %s3517_s0 = inlined_call_operand.smem [shape: u32[35], index: -1, kind: input, shape index: {}] }
   0x1   :  { %s2965_s5 = sld [smem:[%s3517_s0]]   ;;  %s2912_s14 = smov 3  }
   0x2   :  { %s2970_s9 = sld [smem:[%s3517_s0 + %s2910_s6]]   ;;  %s2913_s18 = smov 4  }
   0x3   :  { %s2975_s13 = sld [smem:[%s3517_s0 + %s2911_s10]]   ;;  %s2914_s22 = smov 5  }
   0x4   :  { %s2980_s17 = sld [smem:[%s3517_s0 + %s2912_s14]]   ;;  %s2915_s26 = smov 6  }
   0x5   :  { %s2985_s21 = sld [smem:[%s3517_s0 + %s2913_s18]]   ;;  %s2916_s30 = smov 7  }
   0x6   :  { %s2990_s25 = sld [smem:[%s3517_s0 + %s2914_s22]]   ;;  %s2917_s4 = smov 8  }
   0x7   :  { %3530 = sst [smem:[#allocation12_spill]] %s2965_s5  ;;  %s2918_s10 = smov 9  }
   0x8   :  { %3531 = sst [smem:[#allocation13_spill]] %s2970_s9  ;;  %s2919_s15 = smov 10  }
   0x9   :  { %3532 = sst [smem:[#allocation14_spill]] %s2975_s13  ;;  %s2920_s20 = smov 11  }
   0xa   :  { %3533 = sst [smem:[#allocation15_spill]] %s2980_s17  ;;  %s2922_s1 = smov 13  }
   0xb   :  { %3534 = sst [smem:[#allocation16_spill]] %s2985_s21  ;;  %s2923_s7 = smov 14  }
   0xc   :  { %3535 = sst [smem:[#allocation17_spill]] %s2990_s25  ;;  %s2925_s22 = smov 16  }
   0xd   :  { %s2995_s29 = sld [smem:[%s3517_s0 + %s2915_s26]]   ;;  %s2921_s26 = smov 12  }
   0xe   :  { %s3000_s3 = sld [smem:[%s3517_s0 + %s2916_s30]]   ;;  %s2926_s28 = smov 17  }
   0xf   :  { %s3005_s8 = sld [smem:[%s3517_s0 + %s2917_s4]]  }
  0x10   :  { %s3010_s14 = sld [smem:[%s3517_s0 + %s2918_s10]]  }
  0x11   :  { %s3015_s19 = sld [smem:[%s3517_s0 + %s2919_s15]]   ;;  %s2924_s15 = smov 15  }
  0x12   :  { %s3020_s24 = sld [smem:[%s3517_s0 + %s2920_s20]]  }
  0x13   :  { %3536 = sst [smem:[#allocation18_spill]] %s2995_s29 }
  0x14   :  { %3537 = sst [smem:[#allocation19_spill]] %s3000_s3 }
  0x15   :  { %3538 = sst [smem:[#allocation20_spill]] %s3005_s8 }
  0x16   :  { %3539 = sst [smem:[#allocation21_spill]] %s3010_s14 }
  0x17   :  { %3540 = sst [smem:[#allocation22_spill]] %s3015_s19 }
  0x18   :  { %3541 = sst [smem:[#allocation23_spill]] %s3020_s24 }
  0x19   :  { %s3025_s30 = sld [smem:[%s3517_s0 + %s2921_s26]]  }
  0x1a   :  { %s3030_s6 = sld [smem:[%s3517_s0 + %s2922_s1]]  }
  0x1b   :  { %s3035_s12 = sld [smem:[%s3517_s0 + %s2923_s7]]   ;;  %s2927_s7 = smov 18  }
  0x1c   :  { %s3040_s20 = sld [smem:[%s3517_s0 + %s2924_s15]]   ;;  %s2928_s15 = smov 19  }
  0x1d   :  { %s3045_s27 = sld [smem:[%s3517_s0 + %s2925_s22]]   ;;  %s2929_s22 = smov 20  }
  0x1e   :  { %s3050_s4 = sld [smem:[%s3517_s0 + %s2926_s28]]   ;;  %s2930_s28 = smov 21  }
  0x1f   :  { %3542 = sst [smem:[#allocation24_spill]] %s3025_s30 }
  0x20   :  { %3543 = sst [smem:[#allocation25_spill]] %s3030_s6 }
  0x21   :  { %3544 = sst [smem:[#allocation26_spill]] %s3035_s12 }
  0x22   :  { %3545 = sst [smem:[#allocation27_spill]] %s3040_s20 }
  0x23   :  { %s3055_s3 = sld [smem:[%s3517_s0 + %s2927_s7]]   ;;  %s2931_s7 = smov 22  }
  0x24   :  { %3546 = sst [smem:[#allocation28_spill]] %s3050_s4 }
  0x25   :  { %s3060_s29 = sld [smem:[%s3517_s0 + %s2928_s15]]   ;;  %s2932_s15 = smov 23  }
  0x26   :  { %s3065_s17 = sld [smem:[%s3517_s0 + %s2929_s22]]   ;;  %s2933_s22 = smov 24  }
  0x27   :  { %s3070_s21 = sld [smem:[%s3517_s0 + %s2930_s28]]   ;;  %s2934_s28 = smov 25  }
  0x28   :  { %s3075_s25 = sld [smem:[%s3517_s0 + %s2931_s7]]   ;;  %s2935_s7 = smov 26  }
  0x29   :  { %3547 = sst [smem:[#allocation29_spill]] %s3055_s3 }
  0x2a   :  { %s3080_s13 = sld [smem:[%s3517_s0 + %s2932_s15]]   ;;  %s2936_s15 = smov 27  }
  0x2b   :  { %3548 = sst [smem:[#allocation30_spill]] %s3060_s29 }
  0x2c   :  { %3549 = sst [smem:[#allocation31_spill]] %s3065_s17 }
  0x2d   :  { %s3085_s9 = sld [smem:[%s3517_s0 + %s2933_s22]]   ;;  %s2937_s22 = smov 28  }
  0x2e   :  { %3550 = sst [smem:[#allocation32_spill]] %s3075_s25 }
  0x2f   :  { %s3090_s5 = sld [smem:[%s3517_s0 + %s2934_s28]]   ;;  %s2938_s28 = smov 29  }
  0x30   :  { %3551 = sst [smem:[#allocation33_spill]] %s3080_s13 }
  0x31   :  { %s3095_s25 = sld [smem:[%s3517_s0 + %s2935_s7]]   ;;  %s2939_s7 = smov 30  }
  0x32   :  { %s3100_s13 = sld [smem:[%s3517_s0 + %s2936_s15]]   ;;  %s2940_s15 = smov 31  }
  0x33   :  { %3552 = sst [smem:[#allocation34_spill]] %s3085_s9 }
  0x34   :  { %s3105_s9 = sld [smem:[%s3517_s0 + %s2937_s22]]   ;;  %s2941_s22 = smov 32  }
  0x35   :  { %3553 = sst [smem:[#allocation35_spill]] %s3090_s5 }
  0x36   :  { %s3110_s5 = sld [smem:[%s3517_s0 + %s2938_s28]]   ;;  %s2942_s28 = smov 33  }
  0x37   :  { %3554 = sst [smem:[#allocation36_spill]] %s3095_s25 }
  0x38   :  { %3555 = sst [smem:[#allocation37_spill]] %s3100_s13 }
  0x39   :  { %s3115_s25 = sld [smem:[%s3517_s0 + %s2939_s7]]   ;;  %s2943_s7 = smov 34  }
  0x3a   :  { %3556 = sst [smem:[#allocation38_spill]] %s3105_s9 }
  0x3b   :  { %s3120_s13 = sld [smem:[%s3517_s0 + %s2940_s15]]  }
  0x3c   :  { %3557 = sst [smem:[#allocation39_spill]] %s3110_s5 }
  0x3d   :  { %s3125_s9 = sld [smem:[%s3517_s0 + %s2941_s22]]  }
  0x3e   :  { %s3130_s5 = sld [smem:[%s3517_s0 + %s2942_s28]]  }
  0x3f   :  { %3558 = sst [smem:[#allocation40_spill]] %s3115_s25 }
  0x40   :  { %s3135_s25 = sld [smem:[%s3517_s0 + %s2943_s7]]  }
  0x43   :  { %3559 = sst [smem:[#allocation41_spill]] %s3125_s9 }
  0x44   :  { %3560 = sst [smem:[#allocation42_spill]] %s3130_s5 }
  0x46   :  { %3561 = sst [smem:[#allocation43_spill]] %s3135_s25 }
  0x47   :  { %75 = vsyncpa [#allocation6], 0 }
  0x48   :  { %76 = vsyncpa [#allocation8], 0  ;;  %s3137_s15 = smov 0  }
  0x49 LB: > { %3562 = sst [smem:[#allocation44_spill]] %s2908_s15  ;;  %s3143_s16 = sadd.s32 4294967295, %s2908_s15   ;;  %s2908_s15 = sphi %s3137_s15, %s82_s15  }
  0x4a   : > { %3563 = sst [smem:[#allocation45_spill]] %s3143_s16  ;;  %p2628_p0 = scmp.ge.s32.totalorder %s2908_s15, 1 }
  0x4b   : > { %p1129_p1 = scmp.lt.s32.totalorder %s2908_s15, 3 }
  0x4d   : > { %p1130_p2 = pnand %p2628_p0, %p1129_p1 }
  0x4e   : > { %p1285_p3 = scmp.lt.s32.totalorder (!%p1130_p2), %s3143_s16, 1  ;;  %s3575_s17 = sld [smem:[#allocation31_spill]] (!%p1130_p2) }
  0x4f   : > { %1133 = sbr.rel (%p1130_p2) target bundleno = 2521 (0x9d9), region = 148  ;;  %s3576_s22 = sld [smem:[#allocation32_spill]] (!%p1130_p2) }
  0x50   : > { %s3577_s26 = sld [smem:[#allocation33_spill]] (!%p1130_p2) }
  0x51   : > { %s3578_s1 = sld [smem:[#allocation34_spill]] (!%p1130_p2) }
  0x52   : > { %s3579_s7 = sld [smem:[#allocation35_spill]] (!%p1130_p2) }
  0x53   : > { %s3580_s15 = sld [smem:[#allocation37_spill]] (!%p1130_p2) }
  0x54   : > { %s3149_s0 = scalar_select %p1285_p3, %s3143_s16, 1 }
  0x55   : > { %s3581_s9 = sld [smem:[#allocation38_spill]] }
  0x56   : > { %s3582_s5 = sld [smem:[#allocation39_spill]]  ;;  %s2678_s23 = smul.u32 56, %s3149_s0 }
  0x57   : > { %s3583_s14 = sld [smem:[#allocation36_spill]]  ;;  %s2672_s10 = sshll.u32 %s3149_s0, 5 }
  0x58   : > { %s3584_s28 = sld [smem:[#allocation40_spill]]  ;;  %s3175_s24 = scalar_lea.vmem %s3045_s27, %s2678_s23 }
  0x59   : > { %s3179_s11 = scalar_lea.vmem %s3575_s17, %s2672_s10  ;;  %s1330_s6 = scalar_lea.vmem %s3070_s21, %s3149_s0 }
  0x5a   : > { %s1333_s25 = scalar_lea.vmem %s3576_s22, %s3149_s0  ;;  %s1336_s30 = scalar_lea.vmem %s3577_s26, %s3149_s0 }
  0x5b   : > { %s1339_s12 = scalar_lea.vmem %s3578_s1, %s3149_s0  ;;  %s1342_s18 = scalar_lea.vmem %s3579_s7, %s3149_s0 }
  0x5c   : > { %s2679_s20 = smul.u32 24, %s3149_s0  ;;  %s1350_s16 = scalar_lea.vmem %s3580_s15, %s3149_s0 }
  0x5d   : > { %s1353_s4 = scalar_lea.vmem %s3581_s9, %s3149_s0  ;;  %s1356_s8 = scalar_lea.vmem %s3582_s5, %s3149_s0 }
  0x5e   : > { %s3199_s3 = scalar_lea.vmem %s3583_s14, %s2679_s20  ;;  %s3202_s19 = scalar_lea.vmem %s3584_s28, %s2672_s10 }
  0x5f   : > { %s1364_s2 = scalar_lea.vmem %s3120_s13, %s3149_s0  ;;  %s3585_s29 = sld [smem:[#allocation45_spill]] }
  0x65   : > { %p2635_p4 = scmp.ne.s32.totalorder %s3585_s29, 0 }
  0x66   : > { %s3586_s23 = sld [smem:[#allocation12_spill]] (!%p2635_p4) }
  0x67   : > { %1368 = sbr.rel (%p2635_p4) target bundleno = 115 (0x73), region = 152  ;;  %s3587_s17 = sld [smem:[#allocation13_spill]] (!%p2635_p4) }
  0x68   : > { %s3588_s22 = sld [smem:[#allocation14_spill]] (!%p2635_p4) }
  0x6c   : > { %v1369_v0 = vld [vmem:[%s3586_s23] sm:$0xff]  ;;  %vm1371_vm0 = vcmask 130048   ;;  %v1370_v1 = vld [vmem:[%s3586_s23 + $0x8] sm:$0x3]  ;;  %vm1373_vm1 = vcmask 123904   ;;  %vm1378_vm2 = vcmask 64512  }
  0x6d   : > { %v1375_v2 = vld [vmem:[%s3587_s17] sm:$0xff]  ;;  %1372 = vst.msk [vmem:[#allocation2] sm:$0xff] %vm1371_vm0, %v1369_v0  ;;  %v1376_v3 = vld [vmem:[%s3587_s17 + $0x8] sm:$0xff]  ;;  %v1377_v4 = vld [vmem:[%s3587_s17 + $0x10] sm:$0xf]  ;;  %vm1381_vm3 = vcmask 60416  }
  0x6e   : > { %1374 = vst.msk [vmem:[#allocation2 + $0x8] sm:$0x3] %vm1373_vm1, %v1370_v1  ;;  %v1383_v5 = vld [vmem:[%s3588_s22] sm:$0x3]  ;;  %vm1384_vm4 = vcmask 91136  }
  0x6f   : > { %1379 = vst.msk [vmem:[#allocation3] sm:$0xff] %vm1378_vm2, %v1375_v2 }
  0x70   : > { %1380 = vst.msk [vmem:[#allocation3 + $0x8] sm:$0xff] %vm1378_vm2, %v1376_v3 }
  0x71   : > { %1382 = vst.msk [vmem:[#allocation3 + $0x10] sm:$0xf] %vm1381_vm3, %v1377_v4 }
  0x72   : > { %1385 = vst.msk [vmem:[#allocation4] sm:$0x3] %vm1384_vm4, %v1383_v5 }
  0x73 PF: > { %vm1567_vm5 = vcmask 91136   ;;  %vm1398_vm6 = vcmask 123904   ;;  %vm1394_vm7 = vcmask 130048   ;;  %vm1475_vm8 = vcmask 64512   ;;  %s3589_s5 = sld [smem:[#allocation26_spill]] }
  0x74   : > { %v1386_v9 = vld [vmem:[#allocation2] sm:$0xff]  ;;  %v2944_v14 = vmov 12.0   ;;  %v2945_v16 = vmov 16.0   ;;  %v2946_v20 = vmov 8.0   ;;  %vm1482_vm12 = vcmask 60416   ;;  %s3590_s9 = sld [smem:[#allocation27_spill]] }
  0x75   : > { %v1387_v7 = vld [vmem:[#allocation2 + $0x8] sm:$0x3]  ;;  %v1395_v11 = vsel %vm1394_vm7, %v1386_v9, 0.0  ;;  %2773 = vrcp.f32 %v2944_v14  ;;  %s3593_s20 = sld [smem:[#allocation17_spill]]  ;;  %vm1619_vm2 = vcmask 1041408   ;;  %vm1693_vm4 = vcmask 15360  }
  0x76   : > { %v1399_v10 = vsel %vm1398_vm6, %v1387_v7, 0.0  ;;  %1396 = vadd.xlane.f32.xlu1 %v1395_v11  ;;  %v3216_v12 = vld [vmem:[#allocation3] sm:$0xff]  ;;  %2775 = vrcp.f32 %v2945_v16  ;;  %s3594_s15 = sld [smem:[#allocation20_spill]] }
  0x77   : > { %v1476_v13 = vsel %vm1475_vm8, %v3216_v12, 0.0  ;;  %2777 = vrcp.f32 %v2946_v20  ;;  %v3225_v43 = vld [vmem:[#allocation3 + $0x8] sm:$0xff]  ;;  %s3595_s26 = sld [smem:[#allocation22_spill]] }
  0x78   : > { %v1479_v46 = vsel %vm1475_vm8, %v3225_v43, 0.0  ;;  %v3248_v57 = vld [vmem:[#allocation3 + $0x10] sm:$0xf]  ;;  %s3596_s28 = sld [smem:[#allocation21_spill]] }
  0x79   : > { %v1391_v6 = vld [vmem:[#allocation4] sm:$0x3]  ;;  %v1483_v58 = vsel %vm1482_vm12, %v3248_v57, 0.0  ;;  %s3591_s29 = scalar_lea.vmem %s3589_s5, %s3149_s0  ;;  %s3597_s1 = sld [smem:[#allocation23_spill]] }
  0x7a   : > { %v1568_v8 = vsel %vm1567_vm5, %v1391_v6, 0.0  ;;  %s3592_s14 = scalar_lea.vmem %s3590_s9, %s3149_s0  ;;  %s3602_s9 = sld [smem:[#allocation24_spill]] }
  0x7b   : > { %1569 = vadd.xlane.f32.xlu0 %v1568_v8  ;;  %v2774_v15 = vpop.eup %2773 }
  0x7c   : > { %v1572_v17 = vmul.f32 12.0, %v2774_v15  ;;  %v2776_v19 = vpop.eup %2775  ;;  %vm1576_vm9 = vweird.f32 %v2774_v15  ;;  %s3598_s7 = scalar_lea.vmem %s3594_s15, %s3149_s0  ;;  %s3607_s15 = sld [smem:[#allocation16_spill]] }
  0x7d   : > { %v1403_v22 = vmul.f32 16.0, %v2776_v19  ;;  %v2778_v25 = vpop.eup %2777  ;;  %vm1407_vm10 = vweird.f32 %v2776_v19  ;;  %s3599_s10 = scalar_lea.vmem %s3595_s26, %s3149_s0 }
  0x7e   : > { %v1573_v18 = vsub.f32 1.0, %v1572_v17  ;;  %v1487_v28 = vmul.f32 8.0, %v2778_v25  ;;  %vm1491_vm11 = vweird.f32 %v2778_v25  ;;  %s3600_s22 = scalar_lea.vmem %s3596_s28, %s3149_s0 }
  0x7f   : > { %v1404_v24 = vsub.f32 1.0, %v1403_v22  ;;  %s3601_s5 = scalar_lea.vmem %s3597_s1, %s3149_s0  ;;  %s3610_s1 = sld [smem:[#allocation15_spill]] }
  0x80   : > { %v1574_v21 = vmul.f32 %v2774_v15, %v1573_v18  ;;  %v1488_v32 = vsub.f32 1.0, %v1487_v28 }
  0x81   : > { %v1405_v27 = vmul.f32 %v2776_v19, %v1404_v24 }
  0x82   : > { %v1575_v23 = vadd.f32 %v2774_v15, %v1574_v21  ;;  %v1489_v36 = vmul.f32 %v2778_v25, %v1488_v32  ;;  %v2753_v21 = vld [vmem:[%s3591_s29] ss:$0 sm:$0xff]  ;;  %s3605_s29 = sld [smem:[#allocation25_spill]]  ;;  %s3608_s26 = smov %s3607_s15 }
  0x83   : > { %1400 = vadd.xlane.f32.xlu0 %v1399_v10  ;;  %v1406_v31 = vadd.f32 %v2776_v19, %v1405_v27 }
  0x84   : > { %v1577_v26 = vsel %vm1576_vm9, %v2774_v15, %v1575_v23  ;;  %v1490_v42 = vadd.f32 %v2778_v25, %v1489_v36 }
  0x85   : > { %v1408_v35 = vsel %vm1407_vm10, %v2776_v19, %v1406_v31 }
  0x86   : > { %v3235_v48 = vsel %vm1491_vm11, %v2778_v25, %v1490_v42  ;;  %v2754_v25 = vld [vmem:[%s3592_s14] ss:$0 sm:$0xff]  ;;  %s3606_s14 = scalar_lea.vmem %s3602_s9, %s3149_s0  ;;  %s3613_s9 = sld [smem:[#allocation29_spill]] }
  0x87   : > { %v2757_v42 = vld [vmem:[%s3599_s10] ss:$0 sm:$0xff]  ;;  %s2948_s10 = smov 40  }
  0x88   : > { %s3609_s28 = scalar_lea.vmem %s3605_s29, %s3149_s0  ;;  %s3614_s29 = sld [smem:[#allocation30_spill]] }
  0x8b   : > { %1477 = vadd.xlane.f32.xlu0 %v1476_v13 }
  0xe9   : > { %v1397_v37 = vpop.xlane.xlu1 %1396 }
  0xea   : > { %v1409_v41 = vmul.f32 %v1408_v35, %v1397_v37  ;;  %v1690_v37 = vld [vmem:[%s3593_s20] sm:$0xff] }
  0xec   : > { %v3233_v47 = vsub.f32 %v1386_v9, %v1409_v41  ;;  %v2755_v41 = vld [vmem:[%s3598_s7] ss:$0 sm:$0xff]  ;;  %s2947_s7 = smov 32  }
  0xee   : > { %v1570_v29 = vpop.xlane.xlu0 %1569  ;;  %v1413_v52 = vmul.f32 %v3233_v47, %v3233_v47 }
  0xef   : > { %v1578_v30 = vmul.f32 %v1577_v26, %v1570_v29 }
  0xf0   : > { %v1415_v55 = vsel %vm1394_vm7, %v1413_v52, 0.0  ;;  %v2756_v52 = vld [vmem:[%s3600_s22] ss:$0 sm:$0xff]  ;;  %s2949_s22 = smov 16  }
  0xf1   : > { %v3220_v33 = vsub.f32 %v1391_v6, %v1578_v30 }
  0xf3   : > { %v1580_v34 = vmul.f32 %v3220_v33, %v3220_v33 }
  0xf5   : > { %v1581_v38 = vsel %vm1567_vm5, %v1580_v34, 0.0 }
  0xf6   : > { %v1401_v39 = vpop.xlane.xlu0 %1400  ;;  %1582 = vadd.xlane.f32.xlu1 %v1581_v38 }
  0xf7   : > { %v1410_v40 = vmul.f32 %v1408_v35, %v1401_v39 }
  0xf9   : > { %v3227_v44 = vsub.f32 %v1387_v7, %v1410_v40 }
  0xfb   : > { %v1414_v45 = vmul.f32 %v3227_v44, %v3227_v44 }
  0xfd   : > { %v1418_v49 = vsel %vm1398_vm6, %v1414_v45, 0.0 }
  0xfe   : > { %1419 = vadd.xlane.f32.xlu2 %v1418_v49  ;;  %v1478_v50 = vpop.xlane.xlu0 %1477  ;;  %1480 = vadd.xlane.f32.xlu1 %v1479_v46 }
  0xff   : > { %v1493_v51 = vmul.f32 %v3235_v48, %v1478_v50 }
 0x101   : > { %v3242_v53 = vsub.f32 %v3216_v12, %v1493_v51 }
 0x103   : > { %v1499_v54 = vmul.f32 %v3242_v53, %v3242_v53 }
 0x105   : > { %v1502_v56 = vsel %vm1475_vm8, %v1499_v54, 0.0  ;;  %v2758_v54 = vld [vmem:[%s3601_s5] ss:$0 sm:$0xff]  ;;  %s3611_s5 = sld [smem:[#allocation28_spill]] }
 0x106   : > { %1503 = vadd.xlane.f32.xlu0 %v1502_v56  ;;  %1416 = vadd.xlane.f32.xlu2 %v1415_v55 }
 0x10e   : > { %1484 = vadd.xlane.f32.xlu2 %v1483_v58 }
 0x169   : > { %v1583_v59 = vpop.xlane.xlu1 %1582 }
 0x16a   : > { %v1584_v60 = vmul.f32 %v1583_v59, %v1577_v26 }
 0x16c   : > { %v1585_v61 = vadd.f32 1e-05, %v1584_v60 }
 0x16e   : > { %2779 = vrsqrt.f32 %v1585_v61  ;;  %vm1592_vm14 = vweird.f32 %v1585_v61 }
 0x171   : > { %v1420_v62 = vpop.xlane.xlu2 %1419  ;;  %v1481_v63 = vpop.xlane.xlu1 %1480 }
 0x172   : > { %v1422_v0 = vmul.f32 %v1420_v62, %v1408_v35  ;;  %v1494_v1 = vmul.f32 %v3235_v48, %v1481_v63 }
 0x174   : > { %v2780_v2 = vpop.eup %2779  ;;  %v1424_v3 = vadd.f32 1e-05, %v1422_v0  ;;  %v3254_v4 = vsub.f32 %v3225_v43, %v1494_v1 }
 0x175   : > { %v1587_v5 = vmul.f32 %v2780_v2, %v1585_v61  ;;  %vm1593_vm13 = vweird.f32 %v2780_v2 }
 0x176   : > { %2781 = vrsqrt.f32 %v1424_v3  ;;  %v1500_v6 = vmul.f32 %v3254_v4, %v3254_v4  ;;  %vm1594_vm15 = vmor %vm1592_vm14, %vm1593_vm13  ;;  %vm1441_vm1 = vweird.f32 %v1424_v3 }
 0x177   : > { %v1588_v7 = vmul.f32 %v2780_v2, %v1587_v5  ;;  %v3306_v5 = vld [vmem:[%s3606_s14] ss:$0 sm:$0xff]  ;;  %s3616_s14 = scalar_lea.vmem %s3614_s29, %s3149_s0 }
 0x178   : > { %v1505_v8 = vsel %vm1475_vm8, %v1500_v6, 0.0  ;;  %v1691_v6 = vld [vmem:[%s3593_s20 + $0x8] sm:$0xff] }
 0x179   : > { %v1589_v9 = vmul.f32 0.5, %v1588_v7  ;;  %v1504_v10 = vpop.xlane.xlu0 %1503  ;;  %v1417_v11 = vpop.xlane.xlu2 %1416  ;;  %1506 = vadd.xlane.f32.xlu1 %v1505_v8 }
 0x17a   : > { %v1511_v13 = vmul.f32 %v1504_v10, %v3235_v48  ;;  %v1421_v14 = vmul.f32 %v1417_v11, %v1408_v35  ;;  %v3317_v10 = vld [vmem:[%s3609_s28] ss:$0 sm:$0xff] }
 0x17b   : > { %v1590_v15 = vsub.f32 1.5, %v1589_v9 }
 0x17c   : > { %v2782_v16 = vpop.eup %2781  ;;  %v1514_v17 = vadd.f32 1e-05, %v1511_v13  ;;  %v3260_v18 = vadd.f32 1e-05, %v1421_v14 }
 0x17d   : > { %v1591_v19 = vmul.f32 %v2780_v2, %v1590_v15  ;;  %v1436_v20 = vmul.f32 %v2782_v16, %v1424_v3  ;;  %vm1442_vm0 = vweird.f32 %v2782_v16 }
 0x17e   : > { %2783 = vrsqrt.f32 %v1514_v17  ;;  %vm1443_vm3 = vmor %vm1441_vm1, %vm1442_vm0  ;;  %vm1523_vm9 = vweird.f32 %v1514_v17  ;;  %vm1431_vm14 = vweird.f32 %v3260_v18  ;;  %vm1609_vm0 = vcmask 80896  }
 0x17f   : > { %v1437_v22 = vmul.f32 %v2782_v16, %v1436_v20  ;;  %2785 = vrsqrt.f32 %v3260_v18  ;;  %v1595_v23 = vsel %vm1594_vm15, %v2780_v2, %v1591_v19 }
 0x180   : > { %v1596_v24 = vmul.f32 %v1595_v23, %v3220_v33  ;;  %v1651_v23 = vld [vmem:[%s3608_s26 + $0x10] sm:$0xf] }
 0x181   : > { %v1438_v26 = vmul.f32 0.5, %v1437_v22  ;;  %v1485_v27 = vpop.xlane.xlu2 %1484  ;;  %v1650_v22 = vld [vmem:[%s3608_s26 + $0x8] sm:$0xff] }
 0x182   : > { %v1495_v28 = vmul.f32 %v3235_v48, %v1485_v27  ;;  %v1600_v29 = vmul.f32 %v2753_v21, %v1596_v24  ;;  %v1692_v21 = vld [vmem:[%s3593_s20 + $0x10] sm:$0xf] }
 0x183   : > { %v1439_v30 = vsub.f32 1.5, %v1438_v26 }
 0x184   : > { %v2784_v31 = vpop.eup %2783  ;;  %v3272_v32 = vsub.f32 %v3248_v57, %v1495_v28  ;;  %v1604_v34 = vadd.f32 %v2754_v25, %v1600_v29  ;;  %v1606_v25 = vld [vmem:[%s3610_s1] sm:$0xff]  ;;  %v1607_v28 = vld [vmem:[%s3610_s1 + $0x8] sm:$0xff] }
 0x185   : > { %v2786_v33 = vpop.eup %2785  ;;  %v1440_v35 = vmul.f32 %v2782_v16, %v1439_v30  ;;  %v1518_v36 = vmul.f32 %v2784_v31, %v1514_v17  ;;  %vm1524_vm10 = vweird.f32 %v2784_v31 }
 0x186   : > { %v1426_v38 = vmul.f32 %v2786_v33, %v3260_v18  ;;  %v1605_v39 = vmax.f32 %v1604_v34, 0.0  ;;  %v1501_v40 = vmul.f32 %v3272_v32, %v3272_v32  ;;  %vm3298_vm11 = vmor %vm1523_vm9, %vm1524_vm10  ;;  %vm1432_vm13 = vweird.f32 %v2786_v33  ;;  %v1608_v34 = vld [vmem:[%s3610_s1 + $0x10] sm:$0xf] }
 0x187   : > { %v1444_v45 = vsel %vm1443_vm3, %v2782_v16, %v1440_v35  ;;  %v1519_v46 = vmul.f32 %v2784_v31, %v1518_v36  ;;  %vm1433_vm15 = vmor %vm1431_vm14, %vm1432_vm13  ;;  %vm1800_vm13 = vcmask 1043456   ;;  %vm1771_vm14 = vcmask 261120  }
 0x188   : > { %v1427_v49 = vmul.f32 %v2786_v33, %v1426_v38  ;;  %2644 = vmatpush.msk.msra.mxu2 %vm1619_vm2, %v1605_v39  ;;  %v1508_v50 = vsel %vm1482_vm12, %v1501_v40, 0.0  ;;  %v3287_v51 = vmul.f32 %v1444_v45, %v3227_v44 }
 0x189   : > { %v1520_v55 = vmul.f32 0.5, %v1519_v46  ;;  %1509 = vadd.xlane.f32.xlu2 %v1508_v50  ;;  %2645 = vmatmul.msk.f32.vlgmr.msra.gmra.mxu2 %vm1693_vm4, %v1690_v37 }
 0x18a   : > { %v1428_v56 = vmul.f32 0.5, %v1427_v49  ;;  %v1451_v58 = vmul.f32 %v2755_v41, %v3287_v51  ;;  %v1465_v59 = vmul.f32 %v2757_v42, %v3287_v51 }
 0x18b   : > { %v1521_v44 = vsub.f32 1.5, %v1520_v55 }
 0x18c   : > { %v1429_v61 = vsub.f32 1.5, %v1428_v56  ;;  %v1456_v62 = vadd.f32 %v2756_v52, %v1451_v58  ;;  %v1470_v63 = vadd.f32 %v2758_v54, %v1465_v59 }
 0x18d   : > { %v1522_v0 = vmul.f32 %v2784_v31, %v1521_v44 }
 0x18e   : > { %v1430_v1 = vmul.f32 %v2786_v33, %v1429_v61  ;;  %v1458_v2 = vmax.f32 %v1456_v62, 0.0  ;;  %v1472_v3 = vmax.f32 %v1470_v63, 0.0 }
 0x18f   : > { %v1526_v7 = vsel %vm3298_vm11, %v2784_v31, %v1522_v0 }
 0x190   : > { %v1434_v8 = vsel %vm1433_vm15, %v2786_v33, %v1430_v1  ;;  %2636 = vmatpush.msk.msra.mxu0 %vm1619_vm2, %v1458_v2  ;;  %2640 = vmatpush.msk.msra.mxu1 %vm1619_vm2, %v1472_v3  ;;  %v1547_v9 = vmul.f32 %v1526_v7, %v3242_v53  ;;  %v1785_v2 = vld [vmem:[%s3175_s24 + $0x30] sm:$0xf]  ;;  %v1784_v3 = vld [vmem:[%s3175_s24 + $0x28] sm:$0xff]  ;;  %vm1775_vm15 = vcmask 326656  }
 0x191   : > { %v3320_v11 = vmul.f32 %v1434_v8, %v3233_v47  ;;  %2646 = vmatmul.msk.f32.gmra.mxu2 %vm1693_vm4, %v1691_v6  ;;  %v1649_v47 = vld [vmem:[%s3607_s15] sm:$0xff]  ;;  %2648 = vmatpush.msk.msra.mxu3 %vm1800_vm13, %v1785_v2  ;;  %v1782_v6 = vld [vmem:[%s3175_s24 + $0x18] sm:$0xff]  ;;  %v1781_v7 = vld [vmem:[%s3175_s24 + $0x10] sm:$0xff]  ;;  %s3617_s15 = sld [smem:[#allocation18_spill]] }
 0x192   : > { %v1553_v13 = vmul.f32 %v3306_v5, %v1547_v9  ;;  %v1780_v8 = vld [vmem:[%s3175_s24 + $0x8] sm:$0xff]  ;;  %v1779_v9 = vld [vmem:[%s3175_s24] sm:$0xff] }
 0x193   : > { %v1450_v14 = vmul.f32 %v2755_v41, %v3320_v11  ;;  %v1464_v15 = vmul.f32 %v2757_v42, %v3320_v11  ;;  %1814 = vmatpush.msra.mxu3 %v1784_v3 }
 0x194   : > { %v1559_v16 = vadd.f32 %v3317_v10, %v1553_v13 }
 0x195   : > { %v1455_v17 = vadd.f32 %v2756_v52, %v1450_v14  ;;  %v1469_v53 = vadd.f32 %v2758_v54, %v1464_v15 }
 0x196   : > { %v1562_v18 = vmax.f32 %v1559_v16, 0.0 }
 0x197   : > { %v1457_v19 = vmax.f32 %v1455_v17, 0.0  ;;  %v1471_v20 = vmax.f32 %v1469_v53, 0.0  ;;  %s3618_s28 = smov %s3617_s15 }
 0x198   : > { %1747 = vrot.lane.b32.xlu1 %v1562_v18, %s2947_s7 }
 0x199   : > { %1638 = vmatpush.msra.mxu0 %v1457_v19  ;;  %1679 = vmatpush.msra.mxu1 %v1471_v20 }
 0x19a   : > { %2641 = vmatmul.msk.f32.vlgmr.msra.gmra.mxu1 %vm1609_vm0, %v1649_v47  ;;  %2647 = vmatmul.msk.f32.gmra.mxu2 %vm1693_vm4, %v1692_v21 }
 0x19b   : > { %2637 = vmatmul.msk.f32.vlgmr.msra.gmra.mxu0 %vm1609_vm0, %v1606_v25 }
 0x1a2   : > { %2642 = vmatmul.msk.f32.gmra.mxu1 %vm1609_vm0, %v1650_v22 }
 0x1a3   : > { %2638 = vmatmul.msk.f32.gmra.mxu0 %vm1609_vm0, %v1607_v28 }
 0x1aa   : > { %2643 = vmatmul.msk.f32.gmra.mxu1 %vm1609_vm0, %v1651_v23 }
 0x1ab   : > { %2639 = vmatmul.msk.f32.gmra.mxu0 %vm1609_vm0, %v1608_v34 }
 0x1ec   : > { %v1507_v24 = vpop.xlane.xlu1 %1506 }
 0x1ed   : > { %v1512_v26 = vmul.f32 %v1507_v24, %v3235_v48 }
 0x1ef   : > { %v1515_v27 = vadd.f32 1e-05, %v1512_v26 }
 0x1f1   : > { %2787 = vrsqrt.f32 %v1515_v27  ;;  %vm1533_vm1 = vweird.f32 %v1515_v27 }
 0x1f7   : > { %v2788_v29 = vpop.eup %2787 }
 0x1f8   : > { %v1528_v30 = vmul.f32 %v2788_v29, %v1515_v27  ;;  %vm1534_vm3 = vweird.f32 %v2788_v29 }
 0x1f9   : > { %vm1535_vm4 = vmor %vm1533_vm1, %vm1534_vm3  ;;  %vm1790_vm1 = vcmask 424960   ;;  %vm1838_vm3 = vcmask 257024  }
 0x1fa   : > { %v1529_v31 = vmul.f32 %v2788_v29, %v1528_v30 }
 0x1fc   : > { %v1530_v33 = vmul.f32 0.5, %v1529_v31  ;;  %v1510_v35 = vpop.xlane.xlu2 %1509 }
 0x1fd   : > { %v1513_v36 = vmul.f32 %v1510_v35, %v3235_v48 }
 0x1fe   : > { %v1531_v37 = vsub.f32 1.5, %v1530_v33 }
 0x1ff   : > { %v1516_v38 = vadd.f32 1e-05, %v1513_v36 }
 0x200   : > { %v1532_v39 = vmul.f32 %v2788_v29, %v1531_v37 }
 0x201   : > { %2789 = vrsqrt.f32 %v1516_v38  ;;  %vm1543_vm9 = vweird.f32 %v1516_v38 }
 0x202   : > { %v1536_v40 = vsel %vm1535_vm4, %v2788_v29, %v1532_v39 }
 0x203   : > { %v1548_v42 = vmul.f32 %v1536_v40, %v3254_v4 }
 0x205   : > { %v1554_v49 = vmul.f32 %v3306_v5, %v1548_v42  ;;  %v2950_v42 = vmov 32.0  }
 0x206   : > { %2791 = vrcp.f32 %v2950_v42 }
 0x207   : > { %v2790_v41 = vpop.eup %2789  ;;  %v1560_v55 = vadd.f32 %v3317_v10, %v1554_v49 }
 0x208   : > { %v1538_v45 = vmul.f32 %v2790_v41, %v1516_v38  ;;  %vm1544_vm10 = vweird.f32 %v2790_v41 }
 0x209   : > { %vm1545_vm11 = vmor %vm1543_vm9, %vm1544_vm10  ;;  %v1563_v59 = vmax.f32 %v1560_v55, 0.0 }
 0x20a   : > { %v1539_v46 = vmul.f32 %v2790_v41, %v1538_v45  ;;  %v1748_v14 = vpop.permute.xlu1 %1747 }
 0x20c   : > { %v1540_v50 = vmul.f32 0.5, %v1539_v46  ;;  %v1723_v52 = vpop.f32.mrf.mxu2  ;;  %v2792_v45 = vpop.eup %2791 }
 0x20d   : > { %1759 = vrot.lane.b32.xlu2 %v1723_v52, %s2948_s10  ;;  %v1843_v46 = vmul.f32 32.0, %v2792_v45  ;;  %vm1847_vm4 = vweird.f32 %v2792_v45 }
 0x20e   : > { %v1541_v54 = vsub.f32 1.5, %v1540_v50 }
 0x20f   : > { %v1844_v49 = vsub.f32 1.0, %v1843_v46 }
 0x210   : > { %v1542_v56 = vmul.f32 %v2790_v41, %v1541_v54 }
 0x211   : > { %v1845_v50 = vmul.f32 %v2792_v45, %v1844_v49 }
 0x212   : > { %v1546_v58 = vsel %vm1545_vm11, %v2790_v41, %v1542_v56 }
 0x213   : > { %v1549_v44 = vmul.f32 %v1546_v58, %v3272_v32  ;;  %v1846_v52 = vadd.f32 %v2792_v45, %v1845_v50 }
 0x214   : > { %v1726_v4 = vpop.f32.mrf.mxu2 }
 0x215   : > { %1749 = vrot.lane.b32.xlu2 %v1563_v59, %s2947_s7  ;;  %v1555_v60 = vmul.f32 %v3306_v5, %v1549_v44  ;;  %1761 = vrot.lane.b32.xlu1 %v1726_v4, %s2948_s10  ;;  %v1783_v5 = vld [vmem:[%s3175_s24 + $0x20] sm:$0xff]  ;;  %s3612_s24 = scalar_lea.vmem %s3611_s5, %s3149_s0  ;;  %v3381_v54 = vsel %vm1847_vm4, %v2792_v45, %v1846_v52 }
 0x216   : > { %1815 = vmatpush.msra.mxu3 %v1783_v5  ;;  %v2761_v31 = vld [vmem:[%s3612_s24] ss:$0 sm:$0xff]  ;;  %v1924_v5 = vld [vmem:[%s3179_s11 + $0x18] sm:$0xff] }
 0x217   : > { %v1681_v61 = vpop.f32.mrf.mxu1  ;;  %v1561_v62 = vadd.f32 %v3317_v10, %v1555_v60  ;;  %1946 = vmatpush.msrb.mxu2 %v1924_v5 }
 0x218   : > { %1735 = vrot.lane.b32.xlu0 %v1681_v61, %s2949_s22  ;;  %1816 = vmatpush.msra.mxu3 %v1782_v6  ;;  %v1640_v10 = vpop.f32.mrf.mxu0  ;;  %v1923_v6 = vld [vmem:[%s3179_s11 + $0x10] sm:$0xff] }
 0x219   : > { %v1564_v63 = vmax.f32 %v1561_v62, 0.0  ;;  %1947 = vmatpush.msrb.mxu2 %v1923_v6 }
 0x21a   : > { %1817 = vmatpush.msra.mxu3 %v1781_v7  ;;  %v1922_v7 = vld [vmem:[%s3179_s11 + $0x8] sm:$0xff] }
 0x21b   : > { %1948 = vmatpush.msrb.mxu2 %v1922_v7 }
 0x21c   : > { %1818 = vmatpush.msra.mxu3 %v1780_v8  ;;  %v1921_v8 = vld [vmem:[%s3179_s11] sm:$0xff]  ;;  %s3615_s11 = scalar_lea.vmem %s3613_s9, %s3149_s0 }
 0x21d   : > { %1751 = vrot.lane.b32.xlu2 %v1564_v63, %s2947_s7  ;;  %v1729_v32 = vpop.f32.mrf.mxu2  ;;  %1949 = vmatpush.msrb.mxu2 %v1921_v8  ;;  %v1971_v8 = vld [vmem:[%s3618_s28 + $0x8] sm:$0x3] }
 0x21e   : > { %1763 = vrot.lane.b32.xlu1 %v1729_v32, %s2948_s10  ;;  %1819 = vmatpush.msra.mxu3 %v1779_v9 }
 0x21f   : > { %v1684_v0 = vpop.f32.mrf.mxu1 }
 0x220   : > { %1737 = vrot.lane.b32.xlu0 %v1684_v0, %s2949_s22  ;;  %v1643_v18 = vpop.f32.mrf.mxu0 }
 0x227   : > { %v1687_v1 = vpop.f32.mrf.mxu1 }
 0x228   : > { %1739 = vrot.lane.b32.xlu0 %v1687_v1, %s2949_s22  ;;  %v1646_v24 = vpop.f32.mrf.mxu0 }
 0x267   : > { %v1760_v13 = vpop.permute.xlu2 %1759 }
 0x26f   : > { %v1750_v20 = vpop.permute.xlu2 %1749 }
 0x277   : > { %v1752_v27 = vpop.permute.xlu2 %1751 }
 0x287   : > { %v1762_v19 = vpop.permute.xlu1 %1761 }
 0x28a   : > { %v1736_v15 = vpop.permute.xlu0 %1735 }
 0x28b   : > { %v1768_v16 = vsel %vm1394_vm7, %v1640_v10, %v1736_v15 }
 0x28c   : > { %v1772_v17 = vsel %vm1771_vm14, %v1768_v16, %v1748_v14 }
 0x28d   : > { %v1776_v53 = vsel %vm1775_vm15, %v1772_v17, %v1760_v13 }
 0x28e   : > { %2649 = vmatmul.msk.f32.vlgmr.msra.gmra.mxu3 %vm1790_vm1, %v1776_v53 }
 0x290   : > { %v1764_v26 = vpop.permute.xlu1 %1763 }
 0x292   : > { %v1738_v47 = vpop.permute.xlu0 %1737 }
 0x293   : > { %v1769_v21 = vsel %vm1394_vm7, %v1643_v18, %v1738_v47 }
 0x294   : > { %v1773_v22 = vsel %vm1771_vm14, %v1769_v21, %v1750_v20 }
 0x295   : > { %v1777_v23 = vsel %vm1775_vm15, %v1773_v22, %v1762_v19 }
 0x296   : > { %2650 = vmatmul.msk.f32.gmra.mxu3 %vm1790_vm1, %v1777_v23 }
 0x29a   : > { %v1740_v25 = vpop.permute.xlu0 %1739 }
 0x29b   : > { %v1770_v28 = vsel %vm1394_vm7, %v1646_v24, %v1740_v25 }
 0x29c   : > { %v1774_v29 = vsel %vm1771_vm14, %v1770_v28, %v1752_v27 }
 0x29d   : > { %v1778_v30 = vsel %vm1775_vm15, %v1774_v29, %v1764_v26  ;;  %v2762_v26 = vld [vmem:[%s3615_s11] ss:$0 sm:$0xff] }
 0x29e   : > { %2651 = vmatmul.msk.f32.gmra.mxu3 %vm1790_vm1, %v1778_v30  ;;  %v2763_v30 = vld [vmem:[%s3616_s14] ss:$0 sm:$0xff] }
 0x311   : > { %v1821_v34 = vpop.f32.mrf.mxu3 }
 0x312   : > { %v1822_v33 = vadd.f32 %v2761_v31, %v1821_v34 }
 0x314   : > { %v1832_v35 = vsel %vm1771_vm14, %v1822_v33, 0.0 }
 0x315   : > { %1833 = vadd.xlane.f32.xlu0 %v1832_v35 }
 0x319   : > { %v1824_v36 = vpop.f32.mrf.mxu3 }
 0x31a   : > { %v1825_v37 = vadd.f32 %v2761_v31, %v1824_v36 }
 0x31c   : > { %v1835_v38 = vsel %vm1771_vm14, %v1825_v37, 0.0 }
 0x31d   : > { %1836 = vadd.xlane.f32.xlu2 %v1835_v38 }
 0x321   : > { %v1827_v39 = vpop.f32.mrf.mxu3 }
 0x322   : > { %v1828_v40 = vadd.f32 %v2761_v31, %v1827_v39 }
 0x324   : > { %v1839_v41 = vsel %vm1838_vm3, %v1828_v40, 0.0 }
 0x325   : > { %1840 = vadd.xlane.f32.xlu1 %v1839_v41 }
 0x388   : > { %v1834_v55 = vpop.xlane.xlu0 %1833 }
 0x389   : > { %v1849_v56 = vmul.f32 %v3381_v54, %v1834_v55 }
 0x38b   : > { %v1852_v58 = vsub.f32 %v1822_v33, %v1849_v56 }
 0x38d   : > { %v1855_v59 = vmul.f32 %v1852_v58, %v1852_v58 }
 0x38f   : > { %v1858_v44 = vsel %vm1771_vm14, %v1855_v59, 0.0 }
 0x390   : > { %1859 = vadd.xlane.f32.xlu0 %v1858_v44  ;;  %v1837_v4 = vpop.xlane.xlu2 %1836 }
 0x391   : > { %v1850_v60 = vmul.f32 %v3381_v54, %v1837_v4 }
 0x393   : > { %v1853_v61 = vsub.f32 %v1825_v37, %v1850_v60  ;;  %v2764_v60 = vld [vmem:[%s1330_s6] ss:$0 sm:$0xff] }
 0x395   : > { %v1856_v62 = vmul.f32 %v1853_v61, %v1853_v61 }
 0x397   : > { %v1861_v63 = vsel %vm1771_vm14, %v1856_v62, 0.0 }
 0x398   : > { %1862 = vadd.xlane.f32.xlu2 %v1861_v63  ;;  %v1841_v32 = vpop.xlane.xlu1 %1840 }
 0x399   : > { %v1851_v0 = vmul.f32 %v3381_v54, %v1841_v32 }
 0x39b   : > { %v3388_v1 = vsub.f32 %v1828_v40, %v1851_v0 }
 0x39d   : > { %v1857_v2 = vmul.f32 %v3388_v1, %v3388_v1 }
 0x39f   : > { %v1864_v3 = vsel %vm1838_vm3, %v1857_v2, 0.0 }
 0x3a0   : > { %1865 = vadd.xlane.f32.xlu1 %v1864_v3 }
 0x403   : > { %v1860_v9 = vpop.xlane.xlu0 %1859 }
 0x404   : > { %v1867_v10 = vmul.f32 %v1860_v9, %v3381_v54 }
 0x406   : > { %v1870_v13 = vadd.f32 1e-05, %v1867_v10 }
 0x408   : > { %2793 = vrsqrt.f32 %v1870_v13  ;;  %vm1879_vm10 = vweird.f32 %v1870_v13 }
 0x40b   : > { %v1863_v14 = vpop.xlane.xlu2 %1862 }
 0x40c   : > { %v1868_v15 = vmul.f32 %v1863_v14, %v3381_v54 }
 0x40e   : > { %v2794_v16 = vpop.eup %2793  ;;  %v1871_v17 = vadd.f32 1e-05, %v1868_v15 }
 0x40f   : > { %v1874_v53 = vmul.f32 %v2794_v16, %v1870_v13  ;;  %vm1880_vm9 = vweird.f32 %v2794_v16 }
 0x410   : > { %2795 = vrsqrt.f32 %v1871_v17  ;;  %vm1881_vm11 = vmor %vm1879_vm10, %vm1880_vm9  ;;  %vm1889_vm1 = vweird.f32 %v1871_v17 }
 0x411   : > { %v1875_v18 = vmul.f32 %v2794_v16, %v1874_v53 }
 0x413   : > { %v1876_v19 = vmul.f32 0.5, %v1875_v18  ;;  %v1866_v20 = vpop.xlane.xlu1 %1865 }
 0x414   : > { %v1869_v47 = vmul.f32 %v1866_v20, %v3381_v54 }
 0x415   : > { %v1877_v21 = vsub.f32 1.5, %v1876_v19 }
 0x416   : > { %v2796_v22 = vpop.eup %2795  ;;  %v1872_v23 = vadd.f32 1e-05, %v1869_v47 }
 0x417   : > { %v1878_v24 = vmul.f32 %v2794_v16, %v1877_v21  ;;  %v1884_v25 = vmul.f32 %v2796_v22, %v1871_v17  ;;  %vm1890_vm15 = vweird.f32 %v2796_v22 }
 0x418   : > { %2797 = vrsqrt.f32 %v1872_v23  ;;  %vm1891_vm3 = vmor %vm1889_vm1, %vm1890_vm15  ;;  %vm1899_vm9 = vweird.f32 %v1872_v23  ;;  %vm2024_vm15 = vcmask 58368  }
 0x419   : > { %v1882_v27 = vsel %vm1881_vm11, %v2794_v16, %v1878_v24  ;;  %v1885_v28 = vmul.f32 %v2796_v22, %v1884_v25  ;;  %vm1972_vm11 = vcmask 162816   ;;  %v2090_v25 = vld [vmem:[%s3199_s3 + $0x10] sm:$0xff] }
 0x41a   : > { %v1903_v29 = vmul.f32 %v1882_v27, %v1852_v58  ;;  %2115 = vmatpush.msrb.mxu1 %v2090_v25 }
 0x41b   : > { %v1886_v31 = vmul.f32 0.5, %v1885_v28 }
 0x41c   : > { %v1909_v34 = vmul.f32 %v2762_v26, %v1903_v29 }
 0x41d   : > { %v1887_v33 = vsub.f32 1.5, %v1886_v31 }
 0x41e   : > { %v2798_v35 = vpop.eup %2797  ;;  %v1915_v36 = vadd.f32 %v2763_v30, %v1909_v34 }
 0x41f   : > { %v1888_v37 = vmul.f32 %v2796_v22, %v1887_v33  ;;  %v1894_v38 = vmul.f32 %v2798_v35, %v1872_v23  ;;  %vm1900_vm4 = vweird.f32 %v2798_v35 }
 0x420   : > { %v1918_v39 = vmax.f32 %v1915_v36, 0.0  ;;  %vm1901_vm10 = vmor %vm1899_vm9, %vm1900_vm4  ;;  %vm2095_vm9 = vcmask 195584  }
 0x421   : > { %v1892_v40 = vsel %vm1891_vm3, %v2796_v22, %v1888_v37  ;;  %v1895_v41 = vmul.f32 %v2798_v35, %v1894_v38 }
 0x422   : > { %2652 = vmatmul.msk.f32.vlgmr.msrb.gmra.mxu2 %vm1771_vm14, %v1918_v39  ;;  %v1904_v42 = vmul.f32 %v1892_v40, %v1853_v61  ;;  %v2765_v39 = vld [vmem:[%s1339_s12] ss:$0 sm:$0xff] }
 0x423   : > { %v1896_v45 = vmul.f32 0.5, %v1895_v41 }
 0x424   : > { %v1910_v46 = vmul.f32 %v2762_v26, %v1904_v42  ;;  %v2766_v42 = vld [vmem:[%s1342_s18] ss:$0 sm:$0xff] }
 0x425   : > { %v1897_v49 = vsub.f32 1.5, %v1896_v45 }
 0x426   : > { %v1916_v50 = vadd.f32 %v2763_v30, %v1910_v46 }
 0x427   : > { %v1898_v52 = vmul.f32 %v2798_v35, %v1897_v49 }
 0x428   : > { %v1919_v55 = vmax.f32 %v1916_v50, 0.0 }
 0x429   : > { %v1902_v56 = vsel %vm1901_vm10, %v2798_v35, %v1898_v52  ;;  %vm2130_vm10 = vcmask 254976  }
 0x42a   : > { %2653 = vmatmul.msk.f32.gmra.mxu2 %vm1771_vm14, %v1919_v55  ;;  %v1905_v58 = vmul.f32 %v1902_v56, %v3388_v1 }
 0x42c   : > { %v1911_v59 = vmul.f32 %v2762_v26, %v1905_v58  ;;  %v2089_v26 = vld [vmem:[%s3199_s3 + $0x8] sm:$0xff] }
 0x42d   : > { %2116 = vmatpush.msrb.mxu1 %v2089_v26 }
 0x42e   : > { %v1917_v44 = vadd.f32 %v2763_v30, %v1911_v59 }
 0x430   : > { %v1920_v4 = vmax.f32 %v1917_v44, 0.0 }
 0x432   : > { %2654 = vmatmul.msk.f32.gmra.mxu2 %vm1771_vm14, %v1920_v4 }
 0x4a5   : > { %v1951_v61 = vpop.f32.mrf.mxu2 }
 0x4a6   : > { %v1960_v62 = vadd.f32 %v1951_v61, %v3216_v12  ;;  %v2767_v61 = vld [vmem:[%s1333_s25] ss:$0 sm:$0xff] }
 0x4a8   : > { %v1967_v63 = vadd.f32 %v2764_v60, %v1960_v62  ;;  %v2010_v62 = vmul.f32 %v2767_v61, %v3320_v11  ;;  %v2769_v11 = vld [vmem:[%s1350_s16] ss:$0 sm:$0xff]  ;;  %s2952_s16 = smov [#allocation7]  }
 0x4a9   : > { %s2295_s0 = sshll.u32 %s2952_s16, 4  ;;  %s2296_s0 = int_to_ptr.vmem [resolvable:$true] %s2295_s0 }
 0x4aa   : > { %2259 = vst.msk [vmem:[#allocation3] sm:$0xff] %vm1475_vm8, %v1967_v63  ;;  %v2267_v32 = vsel %vm1475_vm8, %v1967_v63, 0.0 }
 0x4ab   : > { %2270 = vst [vmem:[#allocation7] sm:$0xff] %v2267_v32 }
 0x4ad   : > { %v1954_v0 = vpop.f32.mrf.mxu2 }
 0x4ae   : > { %v1961_v1 = vadd.f32 %v1954_v0, %v3225_v43  ;;  %v1970_v43 = vld [vmem:[%s3617_s15] sm:$0xff] }
 0x4b0   : > { %v1968_v2 = vadd.f32 %v2764_v60, %v1961_v1 }
 0x4b2   : > { %2260 = vst.msk [vmem:[#allocation3 + $0x8] sm:$0xff] %vm1475_vm8, %v1968_v2  ;;  %v2268_v3 = vsel %vm1475_vm8, %v1968_v2, 0.0 }
 0x4b3   : > { %2271 = vst [vmem:[#allocation7 + $0x8] sm:$0xff] %v2268_v3  ;;  %v2011_v3 = vmul.f32 %v2767_v61, %v3287_v51 }
 0x4b5   : > { %v1957_v5 = vpop.f32.mrf.mxu2 }
 0x4b6   : > { %v1962_v12 = vadd.f32 %v1957_v5, %v3248_v57 }
 0x4b8   : > { %v1969_v6 = vadd.f32 %v2764_v60, %v1962_v12  ;;  %v2088_v60 = vld [vmem:[%s3199_s3] sm:$0xff] }
 0x4b9   : > { %2117 = vmatpush.msrb.mxu1 %v2088_v60  ;;  %v2772_v60 = vld [vmem:[%s1364_s2] ss:$0 sm:$0xff] }
 0x4ba   : > { %2261 = vst.msk [vmem:[#allocation3 + $0x10] sm:$0xf] %vm1482_vm12, %v1969_v6  ;;  %v2269_v7 = vsel %vm1475_vm8, %v1969_v6, 0.0  ;;  %2655 = vmatpush.msk.msrb.mxu0 %vm1800_vm13, %v1969_v6 }
 0x4bb   : > { %2272 = vst [vmem:[#allocation7 + $0x10] sm:$0xf] %v2269_v7 }
 0x4bc   : > { %1996 = vmatpush.msrb.mxu0 %v1968_v2 }
 0x4be   : > { %1997 = vmatpush.msrb.mxu0 %v1967_v63  ;;  %v2768_v63 = vld [vmem:[%s1336_s30] ss:$0 sm:$0xff]  ;;  %s3627_s30 = sld [smem:[#allocation45_spill]] }
 0x4bf   : > { %2656 = vmatmul.msk.f32.vlgmr.msrb.gmra.mxu0 %vm1972_vm11, %v1970_v43  ;;  %v2015_v32 = vadd.f32 %v2768_v63, %v2010_v62  ;;  %v2016_v5 = vadd.f32 %v2768_v63, %v2011_v3  ;;  %v2808_v3 = vld [vmem:[#allocation2] sm:$0xff] }
 0x4c1   : > { %v2017_v0 = vmax.f32 %v2015_v32, 0.0  ;;  %v2018_v12 = vmax.f32 %v2016_v5, 0.0  ;;  %v2807_v32 = vld [vmem:[#allocation2 + $0x8] sm:$0x3] }
 0x4c4   : > { %p2692_p5 = scmp.eq.s32.totalorder %s3627_s30, 1 }
 0x4c7   : > { %2657 = vmatmul.msk.f32.gmra.mxu0 %vm1972_vm11, %v1971_v8 }
 0x53c   : > { %v1999_v9 = vpop.f32.mrf.mxu0 }
 0x53d   : > { %v2021_v10 = vsel %vm1475_vm8, %v1999_v9, 0.0 }
 0x53e   : > { %2022 = vadd.xlane.f32.xlu0 %v2021_v10 }
 0x544   : > { %v2002_v57 = vpop.f32.mrf.mxu0 }
 0x545   : > { %v2025_v13 = vsel %vm2024_vm15, %v2002_v57, 0.0 }
 0x546   : > { %2026 = vadd.xlane.f32.xlu2 %v2025_v13 }
 0x5b1   : > { %v2023_v14 = vpop.xlane.xlu0 %2022 }
 0x5b2   : > { %v2028_v15 = vmul.f32 %v2023_v14, %v3235_v48 }
 0x5b4   : > { %v2030_v16 = vsub.f32 %v1999_v9, %v2028_v15 }
 0x5b6   : > { %v2032_v17 = vmul.f32 %v2030_v16, %v2030_v16 }
 0x5b8   : > { %v2034_v53 = vsel %vm1475_vm8, %v2032_v17, 0.0 }
 0x5b9   : > { %2035 = vadd.xlane.f32.xlu1 %v2034_v53  ;;  %v2027_v18 = vpop.xlane.xlu2 %2026 }
 0x5ba   : > { %v2029_v19 = vmul.f32 %v2027_v18, %v3235_v48 }
 0x5bc   : > { %v2031_v20 = vsub.f32 %v2002_v57, %v2029_v19 }
 0x5be   : > { %v2033_v47 = vmul.f32 %v2031_v20, %v2031_v20 }
 0x5c0   : > { %v2037_v21 = vsel %vm2024_vm15, %v2033_v47, 0.0 }
 0x5c1   : > { %2038 = vadd.xlane.f32.xlu0 %v2037_v21  ;;  %v2187_v21 = vld [vmem:[%s3202_s19 + $0x18] sm:$0xff] }
 0x5c2   : > { %2674 = vmatpush.msrb.mxu3 %v2187_v21  ;;  %2210 = vmatpush.msra.mxu1 %v2187_v21 }
 0x62c   : > { %v2036_v22 = vpop.xlane.xlu1 %2035 }
 0x62d   : > { %v2040_v23 = vmul.f32 %v2036_v22, %v3235_v48  ;;  %v2186_v22 = vld [vmem:[%s3202_s19 + $0x10] sm:$0xff] }
 0x62e   : > { %2675 = vmatpush.msrb.mxu3 %v2186_v22  ;;  %2211 = vmatpush.msra.mxu1 %v2186_v22 }
 0x62f   : > { %v2042_v24 = vadd.f32 1e-05, %v2040_v23  ;;  %v2185_v23 = vld [vmem:[%s3202_s19 + $0x8] sm:$0xff] }
 0x630   : > { %2676 = vmatpush.msrb.mxu3 %v2185_v23  ;;  %2212 = vmatpush.msra.mxu1 %v2185_v23 }
 0x631   : > { %2799 = vrsqrt.f32 %v2042_v24  ;;  %vm2050_vm12 = vweird.f32 %v2042_v24 }
 0x634   : > { %v2039_v27 = vpop.xlane.xlu0 %2038 }
 0x635   : > { %v2041_v28 = vmul.f32 %v2039_v27, %v3235_v48 }
 0x637   : > { %v2800_v29 = vpop.eup %2799  ;;  %v2043_v30 = vadd.f32 1e-05, %v2041_v28 }
 0x638   : > { %v2045_v31 = vmul.f32 %v2800_v29, %v2042_v24  ;;  %vm2051_vm8 = vweird.f32 %v2800_v29  ;;  %v2184_v24 = vld [vmem:[%s3202_s19] sm:$0xff]  ;;  %s2951_s19 = smov 112  }
 0x639   : > { %2801 = vrsqrt.f32 %v2043_v30  ;;  %vm2052_vm13 = vmor %vm2050_vm12, %vm2051_vm8  ;;  %vm2060_vm3 = vweird.f32 %v2043_v30  ;;  %2677 = vmatpush.msrb.mxu3 %v2184_v24  ;;  %2213 = vmatpush.msra.mxu1 %v2184_v24 }
 0x63a   : > { %v2046_v34 = vmul.f32 %v2800_v29, %v2045_v31 }
 0x63c   : > { %v2047_v33 = vmul.f32 0.5, %v2046_v34 }
 0x63e   : > { %v2048_v35 = vsub.f32 1.5, %v2047_v33 }
 0x63f   : > { %v2802_v36 = vpop.eup %2801 }
 0x640   : > { %v2049_v37 = vmul.f32 %v2800_v29, %v2048_v35  ;;  %v2055_v38 = vmul.f32 %v2802_v36, %v2043_v30  ;;  %vm2061_vm1 = vweird.f32 %v2802_v36 }
 0x641   : > { %vm2062_vm4 = vmor %vm2060_vm3, %vm2061_vm1 }
 0x642   : > { %v2053_v40 = vsel %vm2052_vm13, %v2800_v29, %v2049_v37  ;;  %v2056_v48 = vmul.f32 %v2802_v36, %v2055_v38 }
 0x643   : > { %v2064_v41 = vmul.f32 %v2053_v40, %v2030_v16  ;;  %v2770_v40 = vld [vmem:[%s1353_s4] ss:$0 sm:$0xff]  ;;  %s3628_s4 = sld [smem:[#allocation42_spill]] }
 0x644   : > { %v2057_v45 = vmul.f32 0.5, %v2056_v48 }
 0x645   : > { %v2069_v46 = vmul.f32 %v2765_v39, %v2064_v41 }
 0x646   : > { %v2058_v49 = vsub.f32 1.5, %v2057_v45 }
 0x647   : > { %v2074_v50 = vadd.f32 %v2766_v42, %v2069_v46 }
 0x648   : > { %v2059_v52 = vmul.f32 %v2802_v36, %v2058_v49 }
 0x649   : > { %v2076_v55 = vmax.f32 %v2074_v50, 0.0  ;;  %s2297_s18 = sshll.u32 %s3628_s4, 4  ;;  %s2830_s24 = scalar_lea.hbm %s3628_s4, 24  ;;  %s2298_s18 = int_to_ptr.hbm [resolvable:$true] %s2297_s18 }
 0x64a   : > { %v2063_v56 = vsel %vm2062_vm4, %v2802_v36, %v2059_v52  ;;  %s2824_s2 = sshra.s32 %s2298_s18, 4  ;;  %s2825_s2 = int_to_ptr.hbm [resolvable:$true] %s2824_s2 }
 0x64b   : > { %2080 = vrot.lane.b32.xlu2 %v2076_v55, %s2949_s22  ;;  %v2065_v58 = vmul.f32 %v2063_v56, %v2031_v20  ;;  %p2831_p9 = scmp.lt.s32.totalorder %s2825_s2, %s3628_s4 }
 0x64d   : > { %v2070_v59 = vmul.f32 %v2765_v39, %v2065_v58 }
 0x64f   : > { %v2075_v44 = vadd.f32 %v2766_v42, %v2070_v59  ;;  %v2771_v42 = vld [vmem:[%s1356_s8] ss:$0 sm:$0xff]  ;;  %s3626_s8 = sld [smem:[#allocation19_spill]] }
 0x651   : > { %v2077_v4 = vmax.f32 %v2075_v44, 0.0 }
 0x653   : > { %2082 = vrot.lane.b32.xlu1 %v2077_v4, %s2949_s22  ;;  %s2826_s22 = scalar_lea.hbm %s2825_s2, 24 }
 0x654   : > { %p2827_p6 = scmp.ne.s32.totalorder %s2825_s2, %s2826_s22  ;;  %p2832_p10 = scmp.lt.s32.totalorder %s2830_s24, %s2826_s22 }
 0x656   : > { %p2828_p7 = pnand %p2827_p6, %p2692_p5  ;;  %p2833_p11 = por %p2832_p10, %p2831_p9 }
 0x658   : > { %p2829_p8 = pneg %p2828_p7 }
 0x65a   : > { %p2834_p12 = pnand %p2833_p11, %p2829_p8 }
 0x6a5   : > { %v2081_v1 = vpop.permute.xlu2 %2080 }
 0x6a6   : > { %v2086_v2 = vsel %vm1394_vm7, %v2017_v0, %v2081_v1 }
 0x6a7   : > { %2658 = vmatmul.msk.f32.vlgmr.msrb.gmra.mxu1 %vm2095_vm9, %v2086_v2 }
 0x6c5   : > { %v2083_v6 = vpop.permute.xlu1 %2082 }
 0x6c6   : > { %v2087_v7 = vsel %vm1394_vm7, %v2018_v12, %v2083_v6 }
 0x6c7   : > { %2659 = vmatmul.msk.f32.gmra.mxu1 %vm2095_vm9, %v2087_v7  ;;  %v2223_v7 = vld [vmem:[%s3626_s8] sm:$0x3] }
 0x724   : > { %v2119_v43 = vpop.f32.mrf.mxu1 }
 0x725   : > { %v2120_v57 = vadd.f32 %v2769_v11, %v2119_v43 }
 0x727   : > { %v2127_v13 = vsel %vm1771_vm14, %v2120_v57, 0.0 }
 0x744   : > { %v2122_v8 = vpop.f32.mrf.mxu1 }
 0x745   : > { %v2123_v9 = vadd.f32 %v2769_v11, %v2122_v8 }
 0x747   : > { %v2131_v10 = vsel %vm2130_vm10, %v2123_v9, 0.0 }
 0x748   : > { %2132 = vadd.xlane.f32.xlu0 %v2131_v10 }
 0x750   : > { %2128 = vadd.xlane.f32.xlu0 %v2127_v13 }
 0x7bb   : > { %v2133_v51 = vpop.xlane.xlu0 %2132 }
 0x7bc   : > { %v2135_v14 = vmul.f32 %v2133_v51, %v3381_v54 }
 0x7be   : > { %v2137_v15 = vsub.f32 %v2123_v9, %v2135_v14 }
 0x7c0   : > { %v2139_v16 = vmul.f32 %v2137_v15, %v2137_v15 }
 0x7c2   : > { %v2143_v17 = vsel %vm2130_vm10, %v2139_v16, 0.0 }
 0x7c3   : > { %2144 = vadd.xlane.f32.xlu0 %v2143_v17  ;;  %v2129_v53 = vpop.xlane.xlu0 %2128 }
 0x7c4   : > { %v2134_v18 = vmul.f32 %v2129_v53, %v3381_v54 }
 0x7c6   : > { %v2136_v19 = vsub.f32 %v2120_v57, %v2134_v18 }
 0x7c8   : > { %v2138_v20 = vmul.f32 %v2136_v19, %v2136_v19 }
 0x7ca   : > { %v2140_v47 = vsel %vm1771_vm14, %v2138_v20, 0.0 }
 0x7cb   : > { %2141 = vadd.xlane.f32.xlu2 %v2140_v47 }
 0x836   : > { %v2145_v25 = vpop.xlane.xlu0 %2144 }
 0x837   : > { %v2147_v26 = vmul.f32 %v2145_v25, %v3381_v54 }
 0x839   : > { %v2149_v27 = vadd.f32 1e-05, %v2147_v26 }
 0x83b   : > { %2803 = vrsqrt.f32 %v2149_v27  ;;  %vm2166_vm15 = vweird.f32 %v2149_v27 }
 0x83e   : > { %v2142_v28 = vpop.xlane.xlu2 %2141 }
 0x83f   : > { %v2146_v29 = vmul.f32 %v2142_v28, %v3381_v54 }
 0x841   : > { %v2804_v30 = vpop.eup %2803  ;;  %v2148_v31 = vadd.f32 1e-05, %v2146_v29 }
 0x842   : > { %v2161_v34 = vmul.f32 %v2804_v30, %v2149_v27  ;;  %vm2167_vm11 = vweird.f32 %v2804_v30 }
 0x843   : > { %2805 = vrsqrt.f32 %v2148_v31  ;;  %vm2168_vm8 = vmor %vm2166_vm15, %vm2167_vm11  ;;  %vm2156_vm13 = vweird.f32 %v2148_v31 }
 0x844   : > { %v2162_v33 = vmul.f32 %v2804_v30, %v2161_v34 }
 0x846   : > { %v2163_v35 = vmul.f32 0.5, %v2162_v33 }
 0x848   : > { %v2164_v36 = vsub.f32 1.5, %v2163_v35 }
 0x849   : > { %v2806_v37 = vpop.eup %2805 }
 0x84a   : > { %v2165_v38 = vmul.f32 %v2804_v30, %v2164_v36  ;;  %v2151_v39 = vmul.f32 %v2806_v37, %v2148_v31  ;;  %vm2157_vm12 = vweird.f32 %v2806_v37 }
 0x84b   : > { %vm2158_vm1 = vmor %vm2156_vm13, %vm2157_vm12 }
 0x84c   : > { %v2169_v48 = vsel %vm2168_vm8, %v2804_v30, %v2165_v38  ;;  %v2152_v41 = vmul.f32 %v2806_v37, %v2151_v39 }
 0x84d   : > { %v2171_v54 = vmul.f32 %v2169_v48, %v2137_v15 }
 0x84e   : > { %v2153_v45 = vmul.f32 0.5, %v2152_v41 }
 0x84f   : > { %v2176_v46 = vmul.f32 %v2770_v40, %v2171_v54 }
 0x850   : > { %v2154_v49 = vsub.f32 1.5, %v2153_v45 }
 0x851   : > { %v2181_v50 = vadd.f32 %v2771_v42, %v2176_v46 }
 0x852   : > { %v2155_v52 = vmul.f32 %v2806_v37, %v2154_v49 }
 0x853   : > { %v2183_v55 = vmax.f32 %v2181_v50, 0.0 }
 0x854   : > { %v2159_v56 = vsel %vm2158_vm1, %v2806_v37, %v2155_v52 }
 0x855   : > { %v2170_v58 = vmul.f32 %v2159_v56, %v2136_v19  ;;  %2661 = vmatmul.msk.f32.vlgmr.msrb.gmra.mxu3 %vm1771_vm14, %v2183_v55 }
 0x857   : > { %v2175_v59 = vmul.f32 %v2770_v40, %v2170_v58 }
 0x859   : > { %v2180_v44 = vadd.f32 %v2771_v42, %v2175_v59 }
 0x85b   : > { %v2182_v4 = vmax.f32 %v2180_v44, 0.0 }
 0x85d   : > { %2660 = vmatmul.msk.f32.vlgmr.msra.gmra.mxu1 %vm1771_vm14, %v2182_v4 }
 0x8d8   : > { %v2218_v61 = vpop.f32.mrf.mxu3 }
 0x8d9   : > { %v2219_v62 = vadd.f32 %v2772_v60, %v2218_v61 }
 0x8da   : > { %v2215_v63 = vpop.f32.mrf.mxu1 }
 0x8db   : > { %v2222_v0 = vadd.f32 %v2807_v32, %v2219_v62  ;;  %v2216_v1 = vadd.f32 %v2772_v60, %v2215_v63  ;;  %2228 = vrot.lane.b32.xlu1 %v2219_v62, %s2951_s19 }
 0x8dd   : > { %2258 = vst.msk [vmem:[#allocation2 + $0x8] sm:$0x3] %vm1398_vm6, %v2222_v0  ;;  %v2264_v2 = vsel %vm1394_vm7, %v2222_v0, 0.0  ;;  %v2221_v5 = vadd.f32 %v2808_v3, %v2216_v1  ;;  %2226 = vrot.lane.b32.xlu0 %v2216_v1, %s2951_s19 }
 0x8de   : > { %2266 = vst [vmem:[#allocation5 + $0x8] sm:$0x3] %v2264_v2 }
 0x8df   : > { %2257 = vst.msk [vmem:[#allocation2] sm:$0xff] %vm1394_vm7, %v2221_v5  ;;  %v2263_v12 = vsel %vm1394_vm7, %v2221_v5, 0.0 }
 0x8e0   : > { %2265 = vst [vmem:[#allocation5] sm:$0xff] %v2263_v12 }
 0x94d   : > { %v2229_v6 = vpop.permute.xlu1 %2228 }
 0x94e   : > { %2662 = vmatpush.msk.msra.mxu0 %vm1619_vm2, %v2229_v6 }
 0x94f   : > { %v2227_v43 = vpop.permute.xlu0 %2226 }
 0x950   : > { %2251 = vmatpush.msra.mxu0 %v2227_v43 }
 0x951   : > { %2663 = vmatmul.msk.f32.vlgmr.msra.gmra.mxu0 %vm1609_vm0, %v2223_v7 }
 0x952   : > { %2837 = shalt.err (!%p2834_p12)
}
 0x953   : > { %s2953_s9 = smov 128   ;;  %s3629_s29 = sld [smem:[#allocation41_spill]] }
 0x954   : > { %s2954_s11 = smov 8   ;;  %s2955_s14 = smov [#allocation5]  }
 0x955   : > { %2683 = dma.vmem_to_hbm [thread:$0]  (%p2692_p5), %s2296_s0, 384, %s2298_s18, [#allocation8], %s2953_s9, %s2953_s9, %s2954_s11  }
 0x956   : > { %s2281_s15 = sshll.u32 %s2955_s14, 4  ;;  %s2282_s15 = int_to_ptr.vmem [resolvable:$true] %s2281_s15 }
 0x959   : > { %s2283_s6 = sshll.u32 %s3629_s29, 4  ;;  %s2858_s5 = scalar_lea.hbm %s3629_s29, 16  ;;  %s2284_s6 = int_to_ptr.hbm [resolvable:$true] %s2283_s6 }
 0x95a   : > { %s2852_s7 = sshra.s32 %s2284_s6, 4  ;;  %s2853_s7 = int_to_ptr.hbm [resolvable:$true] %s2852_s7 }
 0x95b   : > { %s2854_s10 = scalar_lea.hbm %s2853_s7, 16  ;;  %p2859_p2 = scmp.lt.s32.totalorder %s2853_s7, %s3629_s29 }
 0x95c   : > { %p2855_p13 = scmp.ne.s32.totalorder %s2853_s7, %s2854_s10  ;;  %p2860_p3 = scmp.lt.s32.totalorder %s2858_s5, %s2854_s10 }
 0x95e   : > { %p2856_p0 = pnand %p2855_p13, %p2692_p5  ;;  %p2861_p4 = por %p2860_p3, %p2859_p2 }
 0x960   : > { %p2857_p1 = pneg %p2856_p0 }
 0x962   : > { %p2862_p6 = pnand %p2861_p4, %p2857_p1 }
 0x964   : > { %2865 = shalt.err (!%p2862_p6)
}
 0x965   : > { %s3630_s12 = sld [smem:[#allocation43_spill]]  ;;  %s2956_s25 = smov [#allocation9]   ;;  %vm2273_vm6 = vcmask 97280   ;;  %v2809_v8 = vld [vmem:[#allocation4] sm:$0x3] }
 0x966   : > { %2681 = dma.vmem_to_hbm [thread:$0]  (%p2692_p5), %s2282_s15, 256, %s2284_s6, [#allocation6], %s2953_s9, %s2953_s9, %s2954_s11  }
 0x967   : > { %s2310_s3 = sshll.u32 %s2956_s25, 4  ;;  %s2311_s3 = int_to_ptr.vmem [resolvable:$true] %s2310_s3 }
 0x96b   : > { %s2312_s8 = sshll.u32 %s3630_s12, 4  ;;  %s2886_s0 = scalar_lea.hbm %s3630_s12, 2  ;;  %s2313_s8 = int_to_ptr.hbm [resolvable:$true] %s2312_s8 }
 0x96c   : > { %s2880_s19 = sshra.s32 %s2313_s8, 4  ;;  %s2881_s19 = int_to_ptr.hbm [resolvable:$true] %s2880_s19 }
 0x96d   : > { %s2882_s16 = scalar_lea.hbm %s2881_s19, 2  ;;  %p2887_p10 = scmp.lt.s32.totalorder %s2881_s19, %s3630_s12 }
 0x96e   : > { %p2883_p7 = scmp.ne.s32.totalorder %s2881_s19, %s2882_s16  ;;  %p2888_p11 = scmp.lt.s32.totalorder %s2886_s0, %s2882_s16 }
 0x970   : > { %p2884_p8 = pnand %p2883_p7, %p2692_p5  ;;  %p2889_p12 = por %p2888_p11, %p2887_p10 }
 0x972   : > { %p2885_p9 = pneg %p2884_p8 }
 0x974   : > { %p2890_p13 = pnand %p2889_p12, %p2885_p9 }
 0x9ce   : > { %v2253_v11 = vpop.f32.mrf.mxu0 }
 0x9cf   : > { %v2256_v9 = vadd.f32 %v2809_v8, %v2253_v11 }
 0x9d1   : > { %2262 = vst.msk [vmem:[#allocation4] sm:$0x3] %vm1567_vm5, %v2256_v9  ;;  %v2274_v10 = vsel %vm2273_vm6, %v2256_v9, 0.0 }
 0x9d2   : > { %2275 = vst [vmem:[#allocation9] sm:$0x3] %v2274_v10 }
 0x9d3   : > { %2893 = shalt.err (!%p2890_p13)
}
 0x9d4   : > { %2685 = dma.vmem_to_hbm [thread:$0]  (%p2692_p5), %s2311_s3, 32, %s2313_s8, [#allocation8]  }
 0x9d5   : > { %2899 = dma.done.wait (%p2692_p5), [#allocation6], 256  }
 0x9d6   : > { %2901 = vsyncadd (%p2692_p5), [#allocation6], 4294967040 }
 0x9d7   : > { %2903 = dma.done.wait (%p2692_p5), [#allocation8], 416  }
 0x9d8   : > { %2905 = vsyncadd (%p2692_p5), [#allocation8], 4294966880 }
 0x9d9 PF: > { %s3631_s18 = sld [smem:[#allocation44_spill]] }
 0x9df   : > { %s82_s15 = sadd.s32 1, %s3631_s18  }
 0x9e0   : > { %p79_p0 = scmp.ge.s32.totalorder %s82_s15, 4  }
 0x9e2   :  { %81 = sbr.rel (!%p79_p0) target bundleno = 73 (0x49), region = 298 }
 0x9e7   :  { %2336 = vsyncpa [#allocation6], 1 }
 0x9e8   :  { %2338 = vsyncpa [#allocation6 + $0x1], 1 }
 0x9e9   :  { %2339 = vsyncpa [#allocation8], 1 }

</bundles_post_ra>
